<compile_context>
chip_gen: v6e
topology: v6e:2x2x1
jax: 0.10.0
libtpu: 0.0.40
codegen_flags: <defaults>
</compile_context>

<pallas_src>
import functools

import jax
import jax.numpy as jnp
from jax import lax
from jax.experimental import pallas as pl
from jax.experimental.pallas import tpu as pltpu

BN_EPS = 1e-5
LANES = 128


def _round_up(x, m):
    return (x + m - 1) // m * m


def _pick_m_tile(m, cap=1024):
    """Largest multiple-of-8 divisor of m that is <= cap (fallback: m)."""
    best = None
    t = 8
    while t <= min(m, cap):
        if m % t == 0:
            best = t
        t += 8
    # TODO(synk): pad M instead of falling back to one giant block for awkward
    # sizes (the fallback could exceed v7x's 64 MiB VMEM for huge layers).
    return best if best is not None else m


def _pick_row_tile(ho, wo, cap_rows=1024):
    """Largest divisor TH of ho with TH*wo <= cap_rows and (TH*wo) % 8 == 0."""
    best = None
    for th in range(1, ho + 1):
        if ho % th == 0 and (th * wo) % 8 == 0 and th * wo <= cap_rows:
            best = th
    return best if best is not None else ho


# ---------------------------------------------------------------------------
# Kernel 1: fused-im2col conv (single MXU contraction over KH*KW*Cin) plus
# per-tile BN partial statistics (sum, centered sum of squares).
# Grid = (image, spatial row-tile); both axes "parallel".
# ---------------------------------------------------------------------------
def _conv_stats_kernel(xp_ref, w_ref, conv_ref, stats_ref, acc_ref,
                       *, KH, KW, TH, Wo, Cin):
    m = pl.program_id(1)
    h0 = m * TH                           # first output row handled by this tile
    rows = TH * Wo

    # Load the (TH+KH-1, Wp, Cin) input window for this row-tile once, take the
    # KH*KW shifted views, and fold the whole KH*KW*Cin contraction into ONE MXU
    # matmul against the pre-reshaped (KH*KW*Cin, Cpad) weight.
    win = xp_ref[0, pl.ds(h0, TH + KH - 1), :, :]
    patches = [win[kh:kh + TH, kw:kw + Wo, :]
               for kh in range(KH) for kw in range(KW)]
    lhs = jnp.concatenate(patches, axis=-1).reshape(rows, KH * KW * Cin)

    # f32 accumulator lives in a VMEM scratch ref (caps vreg pressure).
    acc_ref[...] = jnp.dot(lhs, w_ref[...], preferred_element_type=jnp.float32)
    acc = acc_ref[...]

    # bf16 conv intermediate for HBM (stats below come from the f32 accumulator).
    conv_ref[...] = acc.astype(conv_ref.dtype)

    # Per-tile BN partials: sum and *centered* M2 (merged with Chan's parallel
    # variance formula in the wrapper -> no E[x^2]-E[x]^2 cancellation).
    s = jnp.sum(acc, axis=0, keepdims=True)                      # (1, Cpad)
    mu = s * (1.0 / rows)
    d = acc - mu
    stats_ref[0:1, :] = s
    stats_ref[1:2, :] = jnp.sum(d * d, axis=0, keepdims=True)


# ---------------------------------------------------------------------------
# Kernel 2: folded BN (y = x*scale + shift) + SiLU over lane-dense M tiles.
# ---------------------------------------------------------------------------
def _bn_silu_kernel(conv_ref, scale_ref, shift_ref, out_ref):
    y = conv_ref[...].astype(jnp.float32) * scale_ref[...] + shift_ref[...]
    sig = pl.reciprocal(1.0 + jnp.exp(-y), approx=True)   # exp + rcp on the EUP
    out_ref[...] = (y * sig).astype(out_ref.dtype)


def conv_bn_act(x_nchw, w_oihw, gamma, beta, *, stride=1, padding=0,
                matmul_dtype=jnp.bfloat16, conv_dtype=jnp.bfloat16,
                out_layout="NCHW"):
    """Fused Conv2d(groups=1, bias=False) + BatchNorm2d(train) + SiLU."""
    N, Cin, H, W = x_nchw.shape
    Cout, Cin_w, KH, KW = w_oihw.shape
    assert Cin == Cin_w, "groups != 1 not supported"
    # TODO(synk): strided conv path (stride > 1) not implemented in the kernel.
    assert stride == 1

    Hp, Wp = H + 2 * padding, W + 2 * padding
    Ho, Wo = Hp - KH + 1, Wp - KW + 1
    # TODO(synk): pad the spatial dim when Ho*Wo is not a multiple of 8.
    assert (Ho * Wo) % 8 == 0

    Cpad = _round_up(Cout, LANES)          # lane-dense output channels
    Kc = KH * KW * Cin                     # folded contraction length
    M = N * Ho * Wo

    TH = _pick_row_tile(Ho, Wo)            # output rows per kernel-1 step
    TMC = TH * Wo                          # conv-tile rows per kernel-1 step
    n_m = Ho // TH
    T = N * n_m                            # number of kernel-1 tiles

    # --- wrapper glue: NCHW -> NHWC, spatial zero-pad, MXU dtype cast ---
    x = jnp.transpose(x_nchw, (0, 2, 3, 1))
    xp = jnp.pad(x, ((0, 0), (padding, padding), (padding, padding), (0, 0)))
    xp = xp.astype(matmul_dtype)

    # PyTorch weight (Cout, Cin, KH, KW) -> (KH*KW*Cin, Cpad): one contraction.
    w = jnp.transpose(w_oihw, (2, 3, 1, 0)).reshape(Kc, Cout).astype(matmul_dtype)
    w = jnp.pad(w, ((0, 0), (0, Cpad - Cout)))

    conv_itemsize = jnp.dtype(conv_dtype).itemsize
    step1 = (2 * Hp * Wp * Cin * xp.dtype.itemsize          # input block (x2 buf)
             + 2 * Kc * Cpad * w.dtype.itemsize             # weight     (x2 buf)
             + 2 * TMC * Cpad * conv_itemsize               # conv block (x2 buf)
             + 2 * 8 * Cpad * 4                             # stats block
             + TMC * Cpad * 4)                              # f32 scratch
    vmem1 = min(max(2 * step1, 32 << 20), 64 << 20)

    kernel1 = functools.partial(_conv_stats_kernel,
                                KH=KH, KW=KW, TH=TH, Wo=Wo, Cin=Cin)
    conv_out, stats = pl.pallas_call(
        kernel1,
        out_shape=(jax.ShapeDtypeStruct((M, Cpad), conv_dtype),
                   jax.ShapeDtypeStruct((T * 8, Cpad), jnp.float32)),
        grid=(N, n_m),
        in_specs=[
            pl.BlockSpec((1, Hp, Wp, Cin), lambda n, m: (n, 0, 0, 0)),
            pl.BlockSpec((Kc, Cpad), lambda n, m: (0, 0)),
        ],
        out_specs=(
            pl.BlockSpec((TMC, Cpad), lambda n, m: (n * n_m + m, 0)),
            pl.BlockSpec((8, Cpad), lambda n, m: (n * n_m + m, 0)),
        ),
        scratch_shapes=[pltpu.VMEM((TMC, Cpad), jnp.float32)],
        compiler_params=pltpu.CompilerParams(
            dimension_semantics=("parallel", "parallel"),
            vmem_limit_bytes=vmem1),
        cost_estimate=pl.CostEstimate(
            flops=2 * M * Kc * Cpad + 6 * M * Cpad,
            transcendentals=0,
            bytes_accessed=(N * Hp * Wp * Cin * xp.dtype.itemsize
                            + Kc * Cpad * w.dtype.itemsize
                            + M * Cpad * conv_itemsize + T * 8 * Cpad * 4)),
    )(xp, w)

    # --- fold per-tile stats into per-channel scale / shift (Chan merge) ---
    stats = stats.reshape(T, 8, Cpad)
    sums = stats[:, 0, :]                                 # per-tile sums
    m2s = stats[:, 1, :]                                  # per-tile centered M2
    mean = jnp.sum(sums, axis=0) / M
    mu_t = sums / TMC
    m2 = jnp.sum(m2s, axis=0) + TMC * jnp.sum((mu_t - mean[None, :]) ** 2, axis=0)
    var = m2 / M                                          # biased batch variance
    inv = lax.rsqrt(var + BN_EPS)
    gamma_p = jnp.pad(gamma.astype(jnp.float32), (0, Cpad - Cout))
    beta_p = jnp.pad(beta.astype(jnp.float32), (0, Cpad - Cout))
    scale = (gamma_p * inv).reshape(1, Cpad)
    shift = (beta_p - mean * gamma_p * inv).reshape(1, Cpad)
    # TODO(synk): BatchNorm running_mean / running_var buffer updates (training
    # side effect) are not materialized; only the forward output is reproduced.

    # --- pass 2: scale/shift + SiLU over lane-dense M tiles ---
    TM = _pick_m_tile(M, cap=1024)
    step2 = 2 * TM * Cpad * (conv_itemsize + 4) + 4 * 2 * Cpad * 4
    vmem2 = min(max(2 * step2, 32 << 20), 64 << 20)
    out = pl.pallas_call(
        _bn_silu_kernel,
        out_shape=jax.ShapeDtypeStruct((M, Cpad), jnp.float32),
        grid=(M // TM,),
        in_specs=[
            pl.BlockSpec((TM, Cpad), lambda i: (i, 0)),
            pl.BlockSpec((1, Cpad), lambda i: (0, 0)),
            pl.BlockSpec((1, Cpad), lambda i: (0, 0)),
        ],
        out_specs=pl.BlockSpec((TM, Cpad), lambda i: (i, 0)),
        compiler_params=pltpu.CompilerParams(
            dimension_semantics=("parallel",),
            vmem_limit_bytes=vmem2),
        cost_estimate=pl.CostEstimate(
            flops=5 * M * Cpad,
            transcendentals=2 * M * Cpad,
            bytes_accessed=M * Cpad * (conv_itemsize + 4) + 2 * Cpad * 4),
    )(conv_out, scale, shift)

    out = out[:, :Cout].reshape(N, Ho, Wo, Cout)          # NHWC
    if out_layout == "NHWC":
        return out
    # TODO(synk): the NCHW transpose is an extra HBM round-trip; prefer NHWC
    # consumers where possible (out_layout="NHWC").
    return jnp.transpose(out, (0, 3, 1, 2))


def reference(x_nchw, w_oihw, gamma, beta, *, stride=1, padding=0,
              round_inputs_to=None, round_conv_to=None):
    """Pure-JAX reference mirroring PyTorch Conv2d + BatchNorm2d(train) + SiLU."""
    x = x_nchw.astype(jnp.float32)
    w = w_oihw.astype(jnp.float32)
    if round_inputs_to is not None:        # mirror the kernel's MXU input rounding
        x = x.astype(round_inputs_to).astype(jnp.float32)
        w = w.astype(round_inputs_to).astype(jnp.float32)
    y = lax.conv_general_dilated(
        x, w, (stride, stride),
        ((padding, padding), (padding, padding)),
        dimension_numbers=("NCHW", "OIHW", "NCHW"),
        precision=lax.Precision.HIGHEST)
    mean = jnp.mean(y, axis=(0, 2, 3), keepdims=True)
    var = jnp.mean((y - mean) ** 2, axis=(0, 2, 3), keepdims=True)
    inv = lax.rsqrt(var + BN_EPS)
    if round_conv_to is not None:          # mirror the bf16 conv intermediate
        y = y.astype(round_conv_to).astype(jnp.float32)
    g = gamma.reshape(1, -1, 1, 1).astype(jnp.float32)
    b = beta.reshape(1, -1, 1, 1).astype(jnp.float32)
    yn = (y - mean) * inv * g + b
    return yn * jax.nn.sigmoid(yn)


if __name__ == "__main__":
    # ConvBnAct(nn.Conv2d, n_in=4, n_out=8, k_size=3, stride=1, padding=1,
    #           groups=1, act=True, bn=True, bias=False)
    key = jax.random.PRNGKey(0)
    kx, kw = jax.random.split(key)

    N, Cin, H, W = 2, 4, 16, 16
    Cout, KH, KW = 8, 3, 3

    x = jax.random.normal(kx, (N, Cin, H, W), dtype=jnp.float32)
    weight = 0.1 * jax.random.normal(kw, (Cout, Cin, KH, KW), dtype=jnp.float32)
    gamma = jnp.ones((Cout,), dtype=jnp.float32)     # nn.BatchNorm2d default init
    beta = jnp.zeros((Cout,), dtype=jnp.float32)

    fwd = jax.jit(functools.partial(conv_bn_act, stride=1, padding=1))
    out = jax.block_until_ready(fwd(x, weight, gamma, beta))
    assert out.shape == (N, Cout, H, W), out.shape

    # Check vs. a reference with the same bf16 rounding of the MXU inputs and of
    # the conv intermediate (BN stats in both are taken from the unrounded conv).
    ref_bf = jax.block_until_ready(
        reference(x, weight, gamma, beta, stride=1, padding=1,
                  round_inputs_to=jnp.bfloat16, round_conv_to=jnp.bfloat16))
    err_bf = float(jnp.max(jnp.abs(out - ref_bf)))
    assert jnp.allclose(out, ref_bf, atol=1e-2, rtol=1e-2), err_bf

    # Loose check vs. the full-f32 reference.
    ref_f32 = jax.block_until_ready(
        reference(x, weight, gamma, beta, stride=1, padding=1))
    err_f32 = float(jnp.max(jnp.abs(out - ref_f32)))
    assert jnp.allclose(out, ref_f32, atol=3e-2, rtol=3e-2), err_f32

    print("KERNEL_OK")
</pallas_src>

<mosaic_0001>
module attributes {stable_mosaic.version = 11 : i64} {
  func.func @_conv_stats_kernel(%arg0: i32, %arg1: i32, %arg2: memref<1x18x18x4xbf16, #tpu.memory_space<vmem>>, %arg3: memref<36x128xbf16, #tpu.memory_space<vmem>>, %arg4: memref<256x128xbf16, #tpu.memory_space<vmem>>, %arg5: memref<8x128xf32, #tpu.memory_space<vmem>>, %arg6: memref<256x128xf32, #tpu.memory_space<vmem>>) attributes {dimension_semantics = [#tpu.dimension_semantics<parallel>, #tpu.dimension_semantics<parallel>], iteration_bounds = array<i64: 2, 1>, scalar_prefetch = 0 : i64, scratch_operands = 1 : i64, tpu.core_type = #tpu.core_type<tc>, window_params = [{transform_indices = @transform_0, window_bounds = array<i64: 1, 18, 18, 4>}, {pipeline_mode = #tpu.pipeline_mode<synchronous>, transform_indices = @transform_1, window_bounds = array<i64: 36, 128>}, {transform_indices = @transform_2, window_bounds = array<i64: 256, 128>}, {transform_indices = @transform_3, window_bounds = array<i64: 8, 128>}]} {
    %c16_i32 = arith.constant 16 : i32
    %0 = arith.muli %arg1, %c16_i32 : i32
    %c0 = arith.constant 0 : index
    %1 = arith.index_cast %0 : i32 to index
    %c0_0 = arith.constant 0 : index
    %c0_1 = arith.constant 0 : index
    %2 = vector.load %arg2[%c0, %1, %c0_0, %c0_1] : memref<1x18x18x4xbf16, #tpu.memory_space<vmem>>, vector<1x18x18x4xbf16>
    %3 = vector.shape_cast %2 : vector<1x18x18x4xbf16> to vector<18x18x4xbf16>
    %4 = vector.extract_strided_slice %3 {offsets = [0, 0, 0], sizes = [16, 16, 4], strides = [1, 1, 1]} : vector<18x18x4xbf16> to vector<16x16x4xbf16>
    %5 = vector.extract_strided_slice %3 {offsets = [0, 1, 0], sizes = [16, 16, 4], strides = [1, 1, 1]} : vector<18x18x4xbf16> to vector<16x16x4xbf16>
    %6 = vector.extract_strided_slice %3 {offsets = [0, 2, 0], sizes = [16, 16, 4], strides = [1, 1, 1]} : vector<18x18x4xbf16> to vector<16x16x4xbf16>
    %7 = vector.extract_strided_slice %3 {offsets = [1, 0, 0], sizes = [16, 16, 4], strides = [1, 1, 1]} : vector<18x18x4xbf16> to vector<16x16x4xbf16>
    %8 = vector.extract_strided_slice %3 {offsets = [1, 1, 0], sizes = [16, 16, 4], strides = [1, 1, 1]} : vector<18x18x4xbf16> to vector<16x16x4xbf16>
    %9 = vector.extract_strided_slice %3 {offsets = [1, 2, 0], sizes = [16, 16, 4], strides = [1, 1, 1]} : vector<18x18x4xbf16> to vector<16x16x4xbf16>
    %10 = vector.extract_strided_slice %3 {offsets = [2, 0, 0], sizes = [16, 16, 4], strides = [1, 1, 1]} : vector<18x18x4xbf16> to vector<16x16x4xbf16>
    %11 = vector.extract_strided_slice %3 {offsets = [2, 1, 0], sizes = [16, 16, 4], strides = [1, 1, 1]} : vector<18x18x4xbf16> to vector<16x16x4xbf16>
    %12 = vector.extract_strided_slice %3 {offsets = [2, 2, 0], sizes = [16, 16, 4], strides = [1, 1, 1]} : vector<18x18x4xbf16> to vector<16x16x4xbf16>
    %13 = tpu.concatenate %4, %5, %6, %7, %8, %9, %10, %11, %12 in 2 : vector<16x16x4xbf16>, vector<16x16x4xbf16>, vector<16x16x4xbf16>, vector<16x16x4xbf16>, vector<16x16x4xbf16>, vector<16x16x4xbf16>, vector<16x16x4xbf16>, vector<16x16x4xbf16>, vector<16x16x4xbf16> -> vector<16x16x36xbf16>
    %14 = vector.shape_cast %13 : vector<16x16x36xbf16> to vector<256x36xbf16>
    %c0_2 = arith.constant 0 : index
    %c0_3 = arith.constant 0 : index
    %15 = vector.load %arg3[%c0_2, %c0_3] : memref<36x128xbf16, #tpu.memory_space<vmem>>, vector<36x128xbf16>
    %cst = arith.constant dense<0.000000e+00> : vector<256x128xf32>
    %16 = tpu.matmul %14, %15, %cst {dimension_numbers = #tpu.dot_dimension_numbers<[1], [0], [0], [1], [0, 0, 1, 1], [], []>} : vector<256x36xbf16>, vector<36x128xbf16>, vector<256x128xf32> -> vector<256x128xf32>
    %c0_4 = arith.constant 0 : index
    %c0_5 = arith.constant 0 : index
    %17 = vector.load %arg6[%c0_4, %c0_5] : memref<256x128xf32, #tpu.memory_space<vmem>>, vector<256x128xf32>
    tpu.vector_store %arg6[%c0_4, %c0_5], %16 {strides = array<i32>} : memref<256x128xf32, #tpu.memory_space<vmem>>, vector<256x128xf32>,
    %c0_6 = arith.constant 0 : index
    %c0_7 = arith.constant 0 : index
    %18 = vector.load %arg6[%c0_6, %c0_7] : memref<256x128xf32, #tpu.memory_space<vmem>>, vector<256x128xf32>
    %19 = arith.truncf %18 : vector<256x128xf32> to vector<256x128xbf16>
    %c0_8 = arith.constant 0 : index
    %c0_9 = arith.constant 0 : index
    %20 = vector.load %arg4[%c0_8, %c0_9] : memref<256x128xbf16, #tpu.memory_space<vmem>>, vector<256x128xbf16>
    tpu.vector_store %arg4[%c0_8, %c0_9], %19 {strides = array<i32>} : memref<256x128xbf16, #tpu.memory_space<vmem>>, vector<256x128xbf16>,
    %cst_10 = arith.constant dense<0.000000e+00> : vector<128xf32>
    %21 = vector.multi_reduction <add>, %18, %cst_10 [0] : vector<256x128xf32> to vector<128xf32>
    %22 = vector.shape_cast %21 : vector<128xf32> to vector<1x128xf32>
    %cst_11 = arith.constant 3.906250e-03 : f32
    %23 = vector.broadcast %cst_11 : f32 to vector<1x128xf32>
    %24 = arith.mulf %22, %23 : vector<1x128xf32>
    %25 = vector.broadcast %24 : vector<1x128xf32> to vector<256x128xf32>
    %26 = arith.subf %18, %25 : vector<256x128xf32>
    %c0_12 = arith.constant 0 : index
    %c0_13 = arith.constant 0 : index
    %27 = vector.load %arg5[%c0_12, %c0_13] : memref<8x128xf32, #tpu.memory_space<vmem>>, vector<1x128xf32>
    tpu.vector_store %arg5[%c0_12, %c0_13], %22 {strides = array<i32>} : memref<8x128xf32, #tpu.memory_space<vmem>>, vector<1x128xf32>,
    %28 = arith.mulf %26, %26 : vector<256x128xf32>
    %cst_14 = arith.constant dense<0.000000e+00> : vector<128xf32>
    %29 = vector.multi_reduction <add>, %28, %cst_14 [0] : vector<256x128xf32> to vector<128xf32>
    %30 = vector.shape_cast %29 : vector<128xf32> to vector<1x128xf32>
    %c1 = arith.constant 1 : index
    %c0_15 = arith.constant 0 : index
    %31 = vector.load %arg5[%c1, %c0_15] : memref<8x128xf32, #tpu.memory_space<vmem>>, vector<1x128xf32>
    tpu.vector_store %arg5[%c1, %c0_15], %30 {strides = array<i32>} : memref<8x128xf32, #tpu.memory_space<vmem>>, vector<1x128xf32>,
    return
  }
  func.func @transform_0(%arg0: i32, %arg1: i32) -> (i32, i32, i32, i32) {
    %c0_i32 = arith.constant 0 : i32
    %c0_i32_0 = arith.constant 0 : i32
    %c0_i32_1 = arith.constant 0 : i32
    %c0_i32_2 = arith.constant 0 : i32
    return %arg0, %c0_i32, %c0_i32_0, %c0_i32_1 : i32, i32, i32, i32
  }
  func.func @transform_1(%arg0: i32, %arg1: i32) -> (i32, i32) {
    %c0_i32 = arith.constant 0 : i32
    %c0_i32_0 = arith.constant 0 : i32
    %c0_i32_1 = arith.constant 0 : i32
    return %c0_i32, %c0_i32_0 : i32, i32
  }
  func.func @transform_2(%arg0: i32, %arg1: i32) -> (i32, i32) {
    %c1_i32 = arith.constant 1 : i32
    %0 = arith.muli %arg0, %c1_i32 : i32
    %1 = arith.addi %0, %arg1 : i32
    %c0_i32 = arith.constant 0 : i32
    %c0_i32_0 = arith.constant 0 : i32
    return %1, %c0_i32 : i32, i32
  }
  func.func @transform_3(%arg0: i32, %arg1: i32) -> (i32, i32) {
    %c1_i32 = arith.constant 1 : i32
    %0 = arith.muli %arg0, %c1_i32 : i32
    %1 = arith.addi %0, %arg1 : i32
    %c0_i32 = arith.constant 0 : i32
    %c0_i32_0 = arith.constant 0 : i32
    return %1, %c0_i32 : i32, i32
  }
}

module attributes {stable_mosaic.version = 11 : i64} {
  func.func @_bn_silu_kernel(%arg0: i32, %arg1: memref<512x128xbf16, #tpu.memory_space<vmem>>, %arg2: memref<1x128xf32, #tpu.memory_space<vmem>>, %arg3: memref<1x128xf32, #tpu.memory_space<vmem>>, %arg4: memref<512x128xf32, #tpu.memory_space<vmem>>) attributes {dimension_semantics = [#tpu.dimension_semantics<parallel>], iteration_bounds = array<i64: 1>, scalar_prefetch = 0 : i64, scratch_operands = 0 : i64, tpu.core_type = #tpu.core_type<tc>, window_params = [{transform_indices = @transform_0, window_bounds = array<i64: 512, 128>}, {pipeline_mode = #tpu.pipeline_mode<synchronous>, transform_indices = @transform_1, window_bounds = array<i64: 1, 128>}, {pipeline_mode = #tpu.pipeline_mode<synchronous>, transform_indices = @transform_2, window_bounds = array<i64: 1, 128>}, {transform_indices = @transform_3, window_bounds = array<i64: 512, 128>}]} {
    %c0 = arith.constant 0 : index
    %c0_0 = arith.constant 0 : index
    %0 = vector.load %arg1[%c0, %c0_0] : memref<512x128xbf16, #tpu.memory_space<vmem>>, vector<512x128xbf16>
    %1 = arith.extf %0 : vector<512x128xbf16> to vector<512x128xf32>
    %c0_1 = arith.constant 0 : index
    %c0_2 = arith.constant 0 : index
    %2 = vector.load %arg2[%c0_1, %c0_2] : memref<1x128xf32, #tpu.memory_space<vmem>>, vector<1x128xf32>
    %3 = vector.broadcast %2 : vector<1x128xf32> to vector<512x128xf32>
    %4 = arith.mulf %1, %3 : vector<512x128xf32>
    %c0_3 = arith.constant 0 : index
    %c0_4 = arith.constant 0 : index
    %5 = vector.load %arg3[%c0_3, %c0_4] : memref<1x128xf32, #tpu.memory_space<vmem>>, vector<1x128xf32>
    %6 = vector.broadcast %5 : vector<1x128xf32> to vector<512x128xf32>
    %7 = arith.addf %4, %6 : vector<512x128xf32>
    %cst = arith.constant 0.000000e+00 : f32
    %8 = vector.broadcast %cst : f32 to vector<512x128xf32>
    %9 = arith.subf %8, %7 : vector<512x128xf32>
    %10 = math.exp %9 : vector<512x128xf32>
    %cst_5 = arith.constant 1.000000e+00 : f32
    %11 = vector.broadcast %cst_5 : f32 to vector<512x128xf32>
    %12 = arith.addf %11, %10 : vector<512x128xf32>
    %13 = tpu.reciprocal %12 {approx = true} : vector<512x128xf32> -> vector<512x128xf32>
    %14 = arith.mulf %7, %13 : vector<512x128xf32>
    %c0_6 = arith.constant 0 : index
    %c0_7 = arith.constant 0 : index
    %15 = vector.load %arg4[%c0_6, %c0_7] : memref<512x128xf32, #tpu.memory_space<vmem>>, vector<512x128xf32>
    tpu.vector_store %arg4[%c0_6, %c0_7], %14 {strides = array<i32>} : memref<512x128xf32, #tpu.memory_space<vmem>>, vector<512x128xf32>,
    return
  }
  func.func @transform_0(%arg0: i32) -> (i32, i32) {
    %c0_i32 = arith.constant 0 : i32
    %c0_i32_0 = arith.constant 0 : i32
    return %arg0, %c0_i32 : i32, i32
  }
  func.func @transform_1(%arg0: i32) -> (i32, i32) {
    %c0_i32 = arith.constant 0 : i32
    %c0_i32_0 = arith.constant 0 : i32
    %c0_i32_1 = arith.constant 0 : i32
    return %c0_i32, %c0_i32_0 : i32, i32
  }
  func.func @transform_2(%arg0: i32) -> (i32, i32) {
    %c0_i32 = arith.constant 0 : i32
    %c0_i32_0 = arith.constant 0 : i32
    %c0_i32_1 = arith.constant 0 : i32
    return %c0_i32, %c0_i32_0 : i32, i32
  }
  func.func @transform_3(%arg0: i32) -> (i32, i32) {
    %c0_i32 = arith.constant 0 : i32
    %c0_i32_0 = arith.constant 0 : i32
    return %arg0, %c0_i32 : i32, i32
  }
}

</mosaic_0001>

<bundles_post_ra>
// kernel: conv_bn_act.3
= control target key start
LH: loop header
LB: loop body
LE: loop exit
PB: predicated region body
PF: predicated region fallthrough
CT: control target
= control target key end

     0   :  { %s1876_s0 = inlined_call_operand.vmem [shape: bf16[512,128], index: 0, kind: input, shape index: {}]   ;;  %s1877_s1 = inlined_call_operand.vmem [shape: f32[1,128], index: 1, kind: input, shape index: {}]   ;;  %s1878_s2 = inlined_call_operand.vmem [shape: f32[1,128], index: 2, kind: input, shape index: {}]   ;;  %s1879_s3 = inlined_call_operand.vmem [shape: f32[512,128], index: 3, kind: output, shape index: {}]  }
   0x1   :  { %v739_v0 = vld [vmem:[%s1876_s0] sm:$0xff]   ;;  %v866_v4 = vld [vmem:[%s1876_s0 + $0x8] sm:$0xff]   ;;  %v867_v5 = vld [vmem:[%s1876_s0 + $0x10] sm:$0xff]  }
   0x2   :  { %v1181_v1 = vld [vmem:[%s1877_s1] ss:$0 sm:$0xff]  ;;  %v740_v2 = vunpack.c.l.bf16 %v739_v0  ;;  %v741_v3 = vunpack.c.h.bf16 %v739_v0  ;;  %v868_v6 = vld [vmem:[%s1876_s0 + $0x18] sm:$0xff]   ;;  %v744_v8 = vunpack.c.l.bf16 %v866_v4  ;;  %v745_v9 = vunpack.c.h.bf16 %v866_v4  ;;  %v870_v37 = vld [vmem:[%s1876_s0 + $0x28] sm:$0xff]  }
   0x3   :  { %v1195_v7 = vld [vmem:[%s1878_s2] ss:$0 sm:$0xff]  ;;  %v748_v10 = vunpack.c.l.bf16 %v867_v5  ;;  %v749_v11 = vunpack.c.h.bf16 %v867_v5  ;;  %v752_v14 = vunpack.c.l.bf16 %v868_v6  ;;  %v753_v15 = vunpack.c.h.bf16 %v868_v6  ;;  %v871_v38 = vld [vmem:[%s1876_s0 + $0x30] sm:$0xff]  }
   0x4   :  { %v149_v12 = vmul.f32 %v740_v2, %v1181_v1  ;;  %v150_v13 = vmul.f32 %v741_v3, %v1181_v1  ;;  %v151_v16 = vmul.f32 %v744_v8, %v1181_v1  ;;  %v152_v17 = vmul.f32 %v745_v9, %v1181_v1  ;;  %v869_v32 = vld [vmem:[%s1876_s0 + $0x20] sm:$0xff]   ;;  %v872_v2 = vld [vmem:[%s1876_s0 + $0x38] sm:$0xff]  }
   0x5   :  { %v153_v18 = vmul.f32 %v748_v10, %v1181_v1  ;;  %v154_v19 = vmul.f32 %v749_v11, %v1181_v1  ;;  %v155_v22 = vmul.f32 %v752_v14, %v1181_v1  ;;  %v156_v23 = vmul.f32 %v753_v15, %v1181_v1  ;;  %v873_v14 = vld [vmem:[%s1876_s0 + $0x40] sm:$0xff]  }
   0x6   :  { %v1204_v20 = vadd.f32 %v1195_v7, %v149_v12  ;;  %v1207_v21 = vadd.f32 %v1195_v7, %v150_v13  ;;  %v1212_v24 = vadd.f32 %v1195_v7, %v151_v16  ;;  %v1215_v25 = vadd.f32 %v1195_v7, %v152_v17 }
   0x7   :  { %v1218_v26 = vadd.f32 %v1195_v7, %v153_v18  ;;  %v1221_v27 = vadd.f32 %v1195_v7, %v154_v19  ;;  %v1226_v30 = vadd.f32 %v1195_v7, %v155_v22  ;;  %v1229_v31 = vadd.f32 %v1195_v7, %v156_v23  ;;  %v874_v18 = vld [vmem:[%s1876_s0 + $0x48] sm:$0xff]  }
   0x8   :  { %v284_v28 = vsub.f32 0.0, %v1204_v20  ;;  %v285_v29 = vsub.f32 0.0, %v1207_v21  ;;  %v286_v33 = vsub.f32 0.0, %v1212_v24  ;;  %v287_v34 = vsub.f32 0.0, %v1215_v25 }
   0x9   :  { %v288_v35 = vsub.f32 0.0, %v1218_v26  ;;  %v289_v36 = vsub.f32 0.0, %v1221_v27  ;;  %v290_v41 = vsub.f32 0.0, %v1226_v30  ;;  %v291_v42 = vsub.f32 0.0, %v1229_v31 }
   0xa   :  { %v348_v39 = vmul.f32 1.442695, %v284_v28  ;;  %v350_v40 = vmul.f32 1.442695, %v285_v29  ;;  %v352_v43 = vmul.f32 1.442695, %v286_v33  ;;  %v756_v46 = vunpack.c.l.bf16 %v869_v32 }
   0xb   :  { %v354_v44 = vmul.f32 1.442695, %v287_v34  ;;  %v356_v45 = vmul.f32 1.442695, %v288_v35  ;;  %v358_v47 = vmul.f32 1.442695, %v289_v36  ;;  %v757_v51 = vunpack.c.h.bf16 %v869_v32 }
   0xc   :  { %897 = vpow2.f32 %v348_v39  ;;  %v360_v48 = vmul.f32 1.442695, %v290_v41  ;;  %v362_v49 = vmul.f32 1.442695, %v291_v42  ;;  %v157_v50 = vmul.f32 %v756_v46, %v1181_v1 }
   0xd   :  { %899 = vpow2.f32 %v350_v40  ;;  %v760_v52 = vunpack.c.l.bf16 %v870_v37  ;;  %v761_v53 = vunpack.c.h.bf16 %v870_v37  ;;  %v764_v54 = vunpack.c.l.bf16 %v871_v38 }
   0xe   :  { %901 = vpow2.f32 %v352_v43  ;;  %v765_v55 = vunpack.c.h.bf16 %v871_v38  ;;  %v1248_v56 = vadd.f32 %v1195_v7, %v157_v50  ;;  %v158_v57 = vmul.f32 %v757_v51, %v1181_v1 }
   0xf   :  { %903 = vpow2.f32 %v354_v44  ;;  %v159_v58 = vmul.f32 %v760_v52, %v1181_v1  ;;  %v160_v59 = vmul.f32 %v761_v53, %v1181_v1  ;;  %v161_v60 = vmul.f32 %v764_v54, %v1181_v1 }
  0x10   :  { %905 = vpow2.f32 %v356_v45  ;;  %v162_v61 = vmul.f32 %v765_v55, %v1181_v1  ;;  %v292_v62 = vsub.f32 0.0, %v1248_v56  ;;  %v1257_v63 = vadd.f32 %v1195_v7, %v158_v57 }
  0x11   :  { %907 = vpow2.f32 %v358_v47  ;;  %v1260_v0 = vadd.f32 %v1195_v7, %v159_v58  ;;  %v1266_v3 = vadd.f32 %v1195_v7, %v160_v59  ;;  %v1269_v4 = vadd.f32 %v1195_v7, %v161_v60 }
  0x12   :  { %909 = vpow2.f32 %v360_v48  ;;  %v1272_v5 = vadd.f32 %v1195_v7, %v162_v61  ;;  %v364_v6 = vmul.f32 1.442695, %v292_v62  ;;  %v293_v8 = vsub.f32 0.0, %v1257_v63  ;;  %v875_v62 = vld [vmem:[%s1876_s0 + $0x50] sm:$0xff]  }
  0x13   :  { %911 = vpow2.f32 %v362_v49  ;;  %v294_v9 = vsub.f32 0.0, %v1260_v0  ;;  %v295_v10 = vsub.f32 0.0, %v1266_v3  ;;  %v296_v11 = vsub.f32 0.0, %v1269_v4 }
  0x14   :  { %v297_v12 = vsub.f32 0.0, %v1272_v5  ;;  %v768_v13 = vunpack.c.l.bf16 %v872_v2  ;;  %913 = vpow2.f32 %v364_v6  ;;  %v366_v15 = vmul.f32 1.442695, %v293_v8 }
  0x15   :  { %v368_v16 = vmul.f32 1.442695, %v294_v9  ;;  %v769_v17 = vunpack.c.h.bf16 %v872_v2  ;;  %v370_v19 = vmul.f32 1.442695, %v295_v10  ;;  %v372_v22 = vmul.f32 1.442695, %v296_v11 }
  0x16   :  { %v374_v23 = vmul.f32 1.442695, %v297_v12  ;;  %v163_v28 = vmul.f32 %v768_v13, %v1181_v1  ;;  %915 = vpow2.f32 %v366_v15  ;;  %v772_v32 = vunpack.c.l.bf16 %v873_v14  ;;  %v876_v10 = vld [vmem:[%s1876_s0 + $0x58] sm:$0xff]  }
  0x17   :  { %v164_v29 = vmul.f32 %v769_v17, %v1181_v1  ;;  %v773_v33 = vunpack.c.h.bf16 %v873_v14  ;;  %917 = vpow2.f32 %v368_v16  ;;  %v776_v35 = vunpack.c.l.bf16 %v874_v18 }
  0x18   :  { %v1288_v34 = vadd.f32 %v1195_v7, %v163_v28  ;;  %v777_v36 = vunpack.c.h.bf16 %v874_v18  ;;  %919 = vpow2.f32 %v370_v19  ;;  %v165_v39 = vmul.f32 %v772_v32, %v1181_v1 }
  0x19   :  { %v898_v37 = vpop.eup %897  ;;  %v1291_v38 = vadd.f32 %v1195_v7, %v164_v29  ;;  %v166_v40 = vmul.f32 %v773_v33, %v1181_v1  ;;  %921 = vpow2.f32 %v372_v22  ;;  %v167_v44 = vmul.f32 %v776_v35, %v1181_v1 }
  0x1a   :  { %v900_v41 = vpop.eup %899  ;;  %v476_v42 = vadd.f32 1.0, %v898_v37  ;;  %v298_v43 = vsub.f32 0.0, %v1288_v34  ;;  %923 = vpow2.f32 %v374_v23  ;;  %v1299_v48 = vadd.f32 %v1195_v7, %v165_v39 }
  0x1b   :  { %v902_v45 = vpop.eup %901  ;;  %v477_v46 = vadd.f32 1.0, %v900_v41  ;;  %v299_v47 = vsub.f32 0.0, %v1291_v38  ;;  %v1302_v52 = vadd.f32 %v1195_v7, %v166_v40  ;;  %v1307_v61 = vadd.f32 %v1195_v7, %v167_v44 }
  0x1c   :  { %v904_v49 = vpop.eup %903  ;;  %925 = vrcp.f32 %v476_v42  ;;  %v478_v50 = vadd.f32 1.0, %v902_v45  ;;  %v376_v51 = vmul.f32 1.442695, %v298_v43  ;;  %v300_v57 = vsub.f32 0.0, %v1299_v48 }
  0x1d   :  { %v906_v53 = vpop.eup %905  ;;  %927 = vrcp.f32 %v477_v46  ;;  %v479_v54 = vadd.f32 1.0, %v904_v49  ;;  %v378_v55 = vmul.f32 1.442695, %v299_v47  ;;  %v301_v60 = vsub.f32 0.0, %v1302_v52 }
  0x1e   :  { %v908_v58 = vpop.eup %907  ;;  %929 = vrcp.f32 %v478_v50  ;;  %v480_v59 = vadd.f32 1.0, %v906_v53  ;;  %v1312_v8 = vmul.f32 1.442695, %v300_v57  ;;  %v168_v9 = vmul.f32 %v777_v36, %v1181_v1 }
  0x1f   :  { %v910_v2 = vpop.eup %909  ;;  %931 = vrcp.f32 %v479_v54  ;;  %v481_v6 = vadd.f32 1.0, %v908_v58  ;;  %v1318_v13 = vmul.f32 1.442695, %v301_v60  ;;  %v302_v14 = vsub.f32 0.0, %v1307_v61  ;;  %v877_v58 = vld [vmem:[%s1876_s0 + $0x60] sm:$0xff]  }
  0x20   :  { %v912_v11 = vpop.eup %911  ;;  %933 = vrcp.f32 %v480_v59  ;;  %v482_v12 = vadd.f32 1.0, %v910_v2  ;;  %v1322_v16 = vadd.f32 %v1195_v7, %v168_v9  ;;  %v780_v17 = vunpack.c.l.bf16 %v875_v62 }
  0x21   :  { %935 = vrcp.f32 %v481_v6  ;;  %v483_v15 = vadd.f32 1.0, %v912_v11  ;;  %v914_v18 = vpop.eup %913  ;;  %v1324_v19 = vmul.f32 1.442695, %v302_v14  ;;  %v781_v22 = vunpack.c.h.bf16 %v875_v62  ;;  %v878_v6 = vld [vmem:[%s1876_s0 + $0x68] sm:$0xff]  }
  0x22   :  { %937 = vrcp.f32 %v482_v12  ;;  %v784_v23 = vunpack.c.l.bf16 %v876_v10  ;;  %v484_v28 = vadd.f32 1.0, %v914_v18  ;;  %v303_v29 = vsub.f32 0.0, %v1322_v16 }
  0x23   :  { %939 = vrcp.f32 %v483_v15  ;;  %v169_v32 = vmul.f32 %v780_v17, %v1181_v1  ;;  %v916_v33 = vpop.eup %915  ;;  %v170_v35 = vmul.f32 %v781_v22, %v1181_v1  ;;  %v785_v37 = vunpack.c.h.bf16 %v876_v10 }
  0x24   :  { %941 = vpow2.f32 %v376_v51  ;;  %v171_v36 = vmul.f32 %v784_v23, %v1181_v1  ;;  %v918_v39 = vpop.eup %917  ;;  %v485_v40 = vadd.f32 1.0, %v916_v33  ;;  %v386_v41 = vmul.f32 1.442695, %v303_v29 }
  0x25   :  { %943 = vrcp.f32 %v484_v28  ;;  %v1331_v42 = vadd.f32 %v1195_v7, %v169_v32  ;;  %v920_v43 = vpop.eup %919  ;;  %v486_v44 = vadd.f32 1.0, %v918_v39  ;;  %v1334_v45 = vadd.f32 %v1195_v7, %v170_v35 }
  0x26   :  { %945 = vpow2.f32 %v378_v55  ;;  %v1337_v46 = vadd.f32 %v1195_v7, %v171_v36  ;;  %v922_v47 = vpop.eup %921  ;;  %v487_v49 = vadd.f32 1.0, %v920_v43  ;;  %v172_v51 = vmul.f32 %v785_v37, %v1181_v1 }
  0x27   :  { %947 = vrcp.f32 %v485_v40  ;;  %v304_v50 = vsub.f32 0.0, %v1331_v42  ;;  %v924_v53 = vpop.eup %923  ;;  %v488_v54 = vadd.f32 1.0, %v922_v47  ;;  %v305_v57 = vsub.f32 0.0, %v1334_v45 }
  0x28   :  { %949 = vrcp.f32 %v486_v44  ;;  %v306_v55 = vsub.f32 0.0, %v1337_v46  ;;  %v489_v60 = vadd.f32 1.0, %v924_v53  ;;  %v1347_v2 = vadd.f32 %v1195_v7, %v172_v51 }
  0x29   :  { %v926_v59 = vpop.eup %925  ;;  %951 = vrcp.f32 %v487_v49  ;;  %v388_v62 = vmul.f32 1.442695, %v304_v50  ;;  %v390_v11 = vmul.f32 1.442695, %v305_v57  ;;  %v788_v18 = vunpack.c.l.bf16 %v877_v58 }
  0x2a   :  { %v928_v9 = vpop.eup %927  ;;  %v604_v10 = vmul.f32 %v926_v59, %v1204_v20  ;;  %953 = vrcp.f32 %v488_v54  ;;  %v392_v12 = vmul.f32 1.442695, %v306_v55  ;;  %v307_v17 = vsub.f32 0.0, %v1347_v2 }
  0x2b   :  { %v930_v14 = vpop.eup %929  ;;  %v605_v15 = vmul.f32 %v928_v9, %v1207_v21  ;;  %955 = vrcp.f32 %v489_v60  ;;  %v789_v20 = vunpack.c.h.bf16 %v877_v58  ;;  %v792_v28 = vunpack.c.l.bf16 %v878_v6  ;;  %v880_v58 = vld [vmem:[%s1876_s0 + $0x78] sm:$0xff]  }
  0x2c   :  { %v932_v22 = vpop.eup %931  ;;  %668 = vst [vmem:[%s1879_s3] sm:$0xff] %v604_v10  ;;  %v606_v23 = vmul.f32 %v930_v14, %v1212_v24  ;;  %957 = vpow2.f32 %v1312_v8  ;;  %v394_v32 = vmul.f32 1.442695, %v307_v17  ;;  %v173_v33 = vmul.f32 %v788_v18, %v1181_v1 }
  0x2d   :  { %v934_v29 = vpop.eup %933  ;;  %669 = vst [vmem:[%s1879_s3 + $0x8] sm:$0xff] %v605_v15  ;;  %v607_v21 = vmul.f32 %v932_v22, %v1215_v25  ;;  %959 = vpow2.f32 %v1318_v13  ;;  %v174_v8 = vmul.f32 %v789_v20, %v1181_v1  ;;  %v175_v36 = vmul.f32 %v792_v28, %v1181_v1  ;;  %v881_v20 = vld [vmem:[%s1876_s0 + $0x80] sm:$0xff]  }
  0x2e   :  { %v936_v35 = vpop.eup %935  ;;  %670 = vst [vmem:[%s1879_s3 + $0x10] sm:$0xff] %v606_v23  ;;  %v608_v24 = vmul.f32 %v934_v29, %v1218_v26  ;;  %961 = vpow2.f32 %v1324_v19  ;;  %v1378_v13 = vadd.f32 %v1195_v7, %v173_v33  ;;  %v793_v39 = vunpack.c.h.bf16 %v878_v6 }
  0x2f   :  { %v938_v37 = vpop.eup %937  ;;  %671 = vst [vmem:[%s1879_s3 + $0x18] sm:$0xff] %v607_v21  ;;  %v609_v25 = vmul.f32 %v936_v35, %v1221_v27  ;;  %963 = vpow2.f32 %v386_v41  ;;  %v1385_v19 = vadd.f32 %v1195_v7, %v174_v8  ;;  %v1388_v43 = vadd.f32 %v1195_v7, %v175_v36 }
  0x30   :  { %v940_v40 = vpop.eup %939  ;;  %672 = vst [vmem:[%s1879_s3 + $0x20] sm:$0xff] %v608_v24  ;;  %v610_v26 = vmul.f32 %v938_v37, %v1226_v30  ;;  %965 = vpow2.f32 %v388_v62  ;;  %v308_v44 = vsub.f32 0.0, %v1378_v13  ;;  %v176_v47 = vmul.f32 %v793_v39, %v1181_v1 }
  0x31   :  { %v942_v27 = vpop.eup %941  ;;  %673 = vst [vmem:[%s1879_s3 + $0x28] sm:$0xff] %v609_v25  ;;  %v611_v41 = vmul.f32 %v940_v40, %v1229_v31  ;;  %967 = vpow2.f32 %v390_v11  ;;  %v309_v50 = vsub.f32 0.0, %v1385_v19  ;;  %v310_v51 = vsub.f32 0.0, %v1388_v43  ;;  %v879_v31 = vld [vmem:[%s1876_s0 + $0x70] sm:$0xff]  }
  0x32   :  { %v944_v30 = vpop.eup %943  ;;  %674 = vst [vmem:[%s1879_s3 + $0x30] sm:$0xff] %v610_v26  ;;  %v490_v49 = vadd.f32 1.0, %v942_v27  ;;  %969 = vpow2.f32 %v392_v12  ;;  %v396_v57 = vmul.f32 1.442695, %v308_v44  ;;  %v1409_v55 = vadd.f32 %v1195_v7, %v176_v47 }
  0x33   :  { %v946_v53 = vpop.eup %945  ;;  %675 = vst [vmem:[%s1879_s3 + $0x38] sm:$0xff] %v611_v41  ;;  %v612_v54 = vmul.f32 %v944_v30, %v1248_v56  ;;  %971 = vpow2.f32 %v394_v32  ;;  %v398_v62 = vmul.f32 1.442695, %v309_v50  ;;  %v400_v6 = vmul.f32 1.442695, %v310_v51 }
  0x34   :  { %v948_v59 = vpop.eup %947  ;;  %973 = vrcp.f32 %v490_v49  ;;  %v491_v60 = vadd.f32 1.0, %v946_v53  ;;  %v311_v10 = vsub.f32 0.0, %v1409_v55  ;;  %v796_v11 = vunpack.c.l.bf16 %v879_v31 }
  0x35   :  { %v950_v9 = vpop.eup %949  ;;  %676 = vst [vmem:[%s1879_s3 + $0x40] sm:$0xff] %v612_v54  ;;  %v613_v56 = vmul.f32 %v948_v59, %v1257_v63  ;;  %975 = vpow2.f32 %v396_v57  ;;  %v797_v15 = vunpack.c.h.bf16 %v879_v31  ;;  %v800_v17 = vunpack.c.l.bf16 %v880_v58  ;;  %v882_v31 = vld [vmem:[%s1876_s0 + $0x88] sm:$0xff]  }
  0x36   :  { %v952_v12 = vpop.eup %951  ;;  %v614_v14 = vmul.f32 %v950_v9, %v1260_v0  ;;  %977 = vrcp.f32 %v491_v60  ;;  %v402_v23 = vmul.f32 1.442695, %v311_v10  ;;  %v177_v63 = vmul.f32 %v796_v11, %v1181_v1 }
  0x37   :  { %v954_v18 = vpop.eup %953  ;;  %677 = vst [vmem:[%s1879_s3 + $0x48] sm:$0xff] %v613_v56  ;;  %v615_v22 = vmul.f32 %v952_v12, %v1266_v3  ;;  %979 = vpow2.f32 %v398_v62  ;;  %v178_v29 = vmul.f32 %v797_v15, %v1181_v1  ;;  %v179_v3 = vmul.f32 %v800_v17, %v1181_v1 }
  0x38   :  { %v956_v28 = vpop.eup %955  ;;  %678 = vst [vmem:[%s1879_s3 + $0x50] sm:$0xff] %v614_v14  ;;  %v616_v0 = vmul.f32 %v954_v18, %v1269_v4  ;;  %981 = vpow2.f32 %v400_v6  ;;  %v1439_v33 = vadd.f32 %v1195_v7, %v177_v63  ;;  %v801_v35 = vunpack.c.h.bf16 %v880_v58 }
  0x39   :  { %v958_v21 = vpop.eup %957  ;;  %679 = vst [vmem:[%s1879_s3 + $0x58] sm:$0xff] %v615_v22  ;;  %v617_v32 = vmul.f32 %v956_v28, %v1272_v5  ;;  %983 = vpow2.f32 %v402_v23  ;;  %v1445_v8 = vadd.f32 %v1195_v7, %v178_v29  ;;  %v1448_v36 = vadd.f32 %v1195_v7, %v179_v3 }
  0x3a   :  { %v960_v24 = vpop.eup %959  ;;  %680 = vst [vmem:[%s1879_s3 + $0x60] sm:$0xff] %v616_v0  ;;  %v492_v4 = vadd.f32 1.0, %v958_v21  ;;  %v804_v37 = vunpack.c.l.bf16 %v881_v20  ;;  %v312_v39 = vsub.f32 0.0, %v1439_v33  ;;  %v180_v40 = vmul.f32 %v801_v35, %v1181_v1  ;;  %v883_v35 = vld [vmem:[%s1876_s0 + $0x90] sm:$0xff]  }
  0x3b   :  { %v962_v25 = vpop.eup %961  ;;  %681 = vst [vmem:[%s1879_s3 + $0x68] sm:$0xff] %v617_v32  ;;  %v493_v5 = vadd.f32 1.0, %v960_v24  ;;  %v805_v26 = vunpack.c.h.bf16 %v881_v20  ;;  %v313_v44 = vsub.f32 0.0, %v1445_v8  ;;  %v314_v47 = vsub.f32 0.0, %v1448_v36 }
  0x3c   :  { %v964_v27 = vpop.eup %963  ;;  %985 = vrcp.f32 %v492_v4  ;;  %v494_v41 = vadd.f32 1.0, %v962_v25  ;;  %v404_v50 = vmul.f32 1.442695, %v312_v39  ;;  %v1458_v51 = vadd.f32 %v1195_v7, %v180_v40 }
  0x3d   :  { %v966_v30 = vpop.eup %965  ;;  %987 = vrcp.f32 %v493_v5  ;;  %v495_v49 = vadd.f32 1.0, %v964_v27  ;;  %v406_v57 = vmul.f32 1.442695, %v313_v44  ;;  %v408_v58 = vmul.f32 1.442695, %v314_v47 }
  0x3e   :  { %v968_v53 = vpop.eup %967  ;;  %989 = vrcp.f32 %v494_v41  ;;  %v496_v54 = vadd.f32 1.0, %v966_v30  ;;  %v315_v62 = vsub.f32 0.0, %v1458_v51  ;;  %v181_v6 = vmul.f32 %v804_v37, %v1181_v1 }
  0x3f   :  { %v970_v59 = vpop.eup %969  ;;  %991 = vrcp.f32 %v495_v49  ;;  %v497_v60 = vadd.f32 1.0, %v968_v53  ;;  %v182_v10 = vmul.f32 %v805_v26, %v1181_v1  ;;  %v808_v11 = vunpack.c.l.bf16 %v882_v31 }
  0x40   :  { %v972_v9 = vpop.eup %971  ;;  %993 = vrcp.f32 %v496_v54  ;;  %v498_v56 = vadd.f32 1.0, %v970_v59  ;;  %v410_v15 = vmul.f32 1.442695, %v315_v62  ;;  %v1467_v17 = vadd.f32 %v1195_v7, %v181_v6 }
  0x41   :  { %v974_v12 = vpop.eup %973  ;;  %995 = vrcp.f32 %v497_v60  ;;  %v499_v14 = vadd.f32 1.0, %v972_v9  ;;  %v1471_v23 = vadd.f32 %v1195_v7, %v182_v10  ;;  %v183_v63 = vmul.f32 %v808_v11, %v1181_v1 }
  0x42   :  { %v976_v18 = vpop.eup %975  ;;  %v618_v22 = vmul.f32 %v974_v12, %v1288_v34  ;;  %997 = vrcp.f32 %v498_v56  ;;  %v316_v0 = vsub.f32 0.0, %v1467_v17  ;;  %v809_v29 = vunpack.c.h.bf16 %v882_v31 }
  0x43   :  { %v978_v20 = vpop.eup %977  ;;  %999 = vrcp.f32 %v499_v14  ;;  %v500_v28 = vadd.f32 1.0, %v976_v18  ;;  %v317_v34 = vsub.f32 0.0, %v1471_v23  ;;  %v1481_v32 = vadd.f32 %v1195_v7, %v183_v63 }
  0x44   :  { %v980_v3 = vpop.eup %979  ;;  %682 = vst [vmem:[%s1879_s3 + $0x70] sm:$0xff] %v618_v22  ;;  %v619_v21 = vmul.f32 %v978_v20, %v1291_v38  ;;  %1001 = vpow2.f32 %v404_v50  ;;  %v412_v37 = vmul.f32 1.442695, %v316_v0  ;;  %v184_v25 = vmul.f32 %v809_v29, %v1181_v1  ;;  %v884_v38 = vld [vmem:[%s1876_s0 + $0x98] sm:$0xff]  }
  0x45   :  { %v982_v24 = vpop.eup %981  ;;  %1003 = vrcp.f32 %v500_v28  ;;  %v501_v4 = vadd.f32 1.0, %v980_v3  ;;  %v414_v40 = vmul.f32 1.442695, %v317_v34  ;;  %v318_v26 = vsub.f32 0.0, %v1481_v32 }
  0x46   :  { %v984_v5 = vpop.eup %983  ;;  %683 = vst [vmem:[%s1879_s3 + $0x78] sm:$0xff] %v619_v21  ;;  %v502_v39 = vadd.f32 1.0, %v982_v24  ;;  %1005 = vpow2.f32 %v406_v57  ;;  %v1495_v41 = vadd.f32 %v1195_v7, %v184_v25  ;;  %v812_v44 = vunpack.c.l.bf16 %v883_v35 }
  0x47   :  { %1007 = vrcp.f32 %v501_v4  ;;  %v503_v27 = vadd.f32 1.0, %v984_v5  ;;  %v416_v47 = vmul.f32 1.442695, %v318_v26  ;;  %v813_v30 = vunpack.c.h.bf16 %v883_v35 }
  0x48   :  { %1009 = vrcp.f32 %v502_v39  ;;  %v816_v49 = vunpack.c.l.bf16 %v884_v38  ;;  %v319_v31 = vsub.f32 0.0, %v1495_v41  ;;  %v185_v53 = vmul.f32 %v812_v44, %v1181_v1 }
  0x49   :  { %v986_v50 = vpop.eup %985  ;;  %1011 = vrcp.f32 %v503_v27  ;;  %v817_v54 = vunpack.c.h.bf16 %v884_v38  ;;  %v186_v60 = vmul.f32 %v813_v30, %v1181_v1 }
  0x4a   :  { %v988_v57 = vpop.eup %987  ;;  %v620_v59 = vmul.f32 %v986_v50, %v1299_v48  ;;  %1013 = vpow2.f32 %v408_v58  ;;  %v187_v62 = vmul.f32 %v816_v49, %v1181_v1  ;;  %v418_v56 = vmul.f32 1.442695, %v319_v31  ;;  %v887_v31 = vld [vmem:[%s1876_s0 + $0xb0] sm:$0xff]  }
  0x4b   :  { %v990_v6 = vpop.eup %989  ;;  %v621_v9 = vmul.f32 %v988_v57, %v1302_v52  ;;  %1015 = vpow2.f32 %v410_v15  ;;  %v1504_v10 = vadd.f32 %v1195_v7, %v185_v53  ;;  %v1511_v58 = vadd.f32 %v1195_v7, %v186_v60 }
  0x4c   :  { %v992_v11 = vpop.eup %991  ;;  %684 = vst [vmem:[%s1879_s3 + $0x80] sm:$0xff] %v620_v59  ;;  %v622_v48 = vmul.f32 %v990_v6, %v1307_v61  ;;  %1017 = vpow2.f32 %v412_v37  ;;  %v1514_v12 = vadd.f32 %v1195_v7, %v187_v62  ;;  %v188_v18 = vmul.f32 %v817_v54, %v1181_v1  ;;  %v885_v61 = vld [vmem:[%s1876_s0 + $0xa0] sm:$0xff]  }
  0x4d   :  { %v994_v52 = vpop.eup %993  ;;  %685 = vst [vmem:[%s1879_s3 + $0x88] sm:$0xff] %v621_v9  ;;  %v623_v14 = vmul.f32 %v992_v11, %v1322_v16  ;;  %1019 = vpow2.f32 %v414_v40  ;;  %v320_v15 = vsub.f32 0.0, %v1504_v10  ;;  %v321_v20 = vsub.f32 0.0, %v1511_v58 }
  0x4e   :  { %v996_v22 = vpop.eup %995  ;;  %686 = vst [vmem:[%s1879_s3 + $0x90] sm:$0xff] %v622_v48  ;;  %v624_v63 = vmul.f32 %v994_v52, %v1331_v42  ;;  %1021 = vpow2.f32 %v416_v47  ;;  %v322_v16 = vsub.f32 0.0, %v1514_v12  ;;  %v1536_v3 = vadd.f32 %v1195_v7, %v188_v18  ;;  %v886_v42 = vld [vmem:[%s1876_s0 + $0xa8] sm:$0xff]  }
  0x4f   :  { %v998_v28 = vpop.eup %997  ;;  %687 = vst [vmem:[%s1879_s3 + $0x98] sm:$0xff] %v623_v14  ;;  %v625_v0 = vmul.f32 %v996_v22, %v1334_v45  ;;  %1023 = vpow2.f32 %v418_v56  ;;  %v420_v29 = vmul.f32 1.442695, %v320_v15  ;;  %v422_v35 = vmul.f32 1.442695, %v321_v20 }
  0x50   :  { %v1000_v21 = vpop.eup %999  ;;  %688 = vst [vmem:[%s1879_s3 + $0xa0] sm:$0xff] %v624_v63  ;;  %v626_v34 = vmul.f32 %v998_v28, %v1337_v46  ;;  %v424_v24 = vmul.f32 1.442695, %v322_v16  ;;  %v820_v4 = vunpack.c.l.bf16 %v885_v61  ;;  %v323_v25 = vsub.f32 0.0, %v1536_v3  ;;  %v888_v16 = vld [vmem:[%s1876_s0 + $0xb8] sm:$0xff]  }
  0x51   :  { %v1002_v45 = vpop.eup %1001  ;;  %689 = vst [vmem:[%s1879_s3 + $0xa8] sm:$0xff] %v625_v0  ;;  %v627_v37 = vmul.f32 %v1000_v21, %v1347_v2  ;;  %1025 = vpow2.f32 %v420_v29  ;;  %v821_v38 = vunpack.c.h.bf16 %v885_v61  ;;  %v824_v40 = vunpack.c.l.bf16 %v886_v42 }
  0x52   :  { %v1004_v5 = vpop.eup %1003  ;;  %690 = vst [vmem:[%s1879_s3 + $0xb0] sm:$0xff] %v626_v34  ;;  %v504_v46 = vadd.f32 1.0, %v1002_v45  ;;  %1027 = vpow2.f32 %v422_v35  ;;  %v189_v39 = vmul.f32 %v820_v4, %v1181_v1  ;;  %v426_v27 = vmul.f32 1.442695, %v323_v25 }
  0x53   :  { %v1006_v26 = vpop.eup %1005  ;;  %691 = vst [vmem:[%s1879_s3 + $0xb8] sm:$0xff] %v627_v37  ;;  %v628_v2 = vmul.f32 %v1004_v5, %v1378_v13  ;;  %1029 = vpow2.f32 %v424_v24  ;;  %v190_v44 = vmul.f32 %v821_v38, %v1181_v1  ;;  %v191_v50 = vmul.f32 %v824_v40, %v1181_v1  ;;  %v889_v38 = vld [vmem:[%s1876_s0 + $0xc0] sm:$0xff]  }
  0x54   :  { %v1008_v47 = vpop.eup %1007  ;;  %1031 = vrcp.f32 %v504_v46  ;;  %v505_v30 = vadd.f32 1.0, %v1006_v26  ;;  %v1560_v49 = vadd.f32 %v1195_v7, %v189_v39  ;;  %v825_v57 = vunpack.c.h.bf16 %v886_v42 }
  0x55   :  { %v1010_v53 = vpop.eup %1009  ;;  %692 = vst [vmem:[%s1879_s3 + $0xc0] sm:$0xff] %v628_v2  ;;  %v629_v13 = vmul.f32 %v1008_v47, %v1385_v19  ;;  %1033 = vpow2.f32 %v426_v27  ;;  %v1571_v54 = vadd.f32 %v1195_v7, %v190_v44  ;;  %v1576_v6 = vadd.f32 %v1195_v7, %v191_v50 }
  0x56   :  { %v1012_v59 = vpop.eup %1011  ;;  %v630_v60 = vmul.f32 %v1010_v53, %v1388_v43  ;;  %1035 = vrcp.f32 %v505_v30  ;;  %v324_v62 = vsub.f32 0.0, %v1560_v49  ;;  %v192_v11 = vmul.f32 %v825_v57, %v1181_v1 }
  0x57   :  { %v1014_v9 = vpop.eup %1013  ;;  %693 = vst [vmem:[%s1879_s3 + $0xc8] sm:$0xff] %v629_v13  ;;  %v631_v19 = vmul.f32 %v1012_v59, %v1409_v55  ;;  %v325_v56 = vsub.f32 0.0, %v1571_v54  ;;  %v828_v48 = vunpack.c.l.bf16 %v887_v31  ;;  %v326_v15 = vsub.f32 0.0, %v1576_v6 }
  0x58   :  { %v1016_v52 = vpop.eup %1015  ;;  %694 = vst [vmem:[%s1879_s3 + $0xd0] sm:$0xff] %v630_v60  ;;  %v506_v43 = vadd.f32 1.0, %v1014_v9  ;;  %v428_v14 = vmul.f32 1.442695, %v324_v62  ;;  %v829_v18 = vunpack.c.h.bf16 %v887_v31  ;;  %v1592_v63 = vadd.f32 %v1195_v7, %v192_v11 }
  0x59   :  { %v1018_v61 = vpop.eup %1017  ;;  %695 = vst [vmem:[%s1879_s3 + $0xd8] sm:$0xff] %v631_v19  ;;  %v507_v55 = vadd.f32 1.0, %v1016_v52  ;;  %v430_v22 = vmul.f32 1.442695, %v325_v56  ;;  %v193_v20 = vmul.f32 %v828_v48, %v1181_v1  ;;  %v432_v29 = vmul.f32 1.442695, %v326_v15 }
  0x5a   :  { %v1020_v28 = vpop.eup %1019  ;;  %1037 = vrcp.f32 %v506_v43  ;;  %v508_v0 = vadd.f32 1.0, %v1018_v61  ;;  %v194_v42 = vmul.f32 %v829_v18, %v1181_v1  ;;  %v327_v35 = vsub.f32 0.0, %v1592_v63  ;;  %v890_v52 = vld [vmem:[%s1876_s0 + $0xc8] sm:$0xff]  }
  0x5b   :  { %v1022_v21 = vpop.eup %1021  ;;  %1039 = vrcp.f32 %v507_v55  ;;  %v509_v34 = vadd.f32 1.0, %v1020_v28  ;;  %v1601_v24 = vadd.f32 %v1195_v7, %v193_v20  ;;  %v832_v25 = vunpack.c.l.bf16 %v888_v16  ;;  %v1638_v55 = vld [vmem:[%s1877_s1] ss:$0 sm:$0xff] }
  0x5c   :  { %v1024_v4 = vpop.eup %1023  ;;  %1041 = vrcp.f32 %v508_v0  ;;  %v510_v45 = vadd.f32 1.0, %v1022_v21  ;;  %v1604_v37 = vadd.f32 %v1195_v7, %v194_v42  ;;  %v434_v46 = vmul.f32 1.442695, %v327_v35 }
  0x5d   :  { %1043 = vrcp.f32 %v509_v34  ;;  %v511_v5 = vadd.f32 1.0, %v1024_v4  ;;  %v328_v39 = vsub.f32 0.0, %v1601_v24  ;;  %v195_v2 = vmul.f32 %v832_v25, %v1181_v1 }
  0x5e   :  { %v1026_v40 = vpop.eup %1025  ;;  %1045 = vrcp.f32 %v510_v45  ;;  %v329_v26 = vsub.f32 0.0, %v1604_v37  ;;  %v833_v27 = vunpack.c.h.bf16 %v888_v16  ;;  %v836_v50 = vunpack.c.l.bf16 %v889_v38 }
  0x5f   :  { %v1028_v44 = vpop.eup %1027  ;;  %1047 = vrcp.f32 %v511_v5  ;;  %v512_v47 = vadd.f32 1.0, %v1026_v40  ;;  %v436_v30 = vmul.f32 1.442695, %v328_v39  ;;  %v1613_v57 = vadd.f32 %v1195_v7, %v195_v2 }
  0x60   :  { %v1030_v31 = vpop.eup %1029  ;;  %v513_v53 = vadd.f32 1.0, %v1028_v44  ;;  %1049 = vpow2.f32 %v428_v14  ;;  %v438_v13 = vmul.f32 1.442695, %v329_v26  ;;  %v196_v62 = vmul.f32 %v833_v27, %v1181_v1 }
  0x61   :  { %v1032_v59 = vpop.eup %1031  ;;  %1051 = vrcp.f32 %v512_v47  ;;  %v514_v60 = vadd.f32 1.0, %v1030_v31  ;;  %v197_v9 = vmul.f32 %v836_v50, %v1181_v1  ;;  %v330_v11 = vsub.f32 0.0, %v1613_v57  ;;  %v891_v1 = vld [vmem:[%s1876_s0 + $0xd0] sm:$0xff]  }
  0x62   :  { %v1034_v19 = vpop.eup %1033  ;;  %v632_v56 = vmul.f32 %v1032_v59, %v1439_v33  ;;  %1053 = vrcp.f32 %v513_v53  ;;  %v837_v48 = vunpack.c.h.bf16 %v889_v38  ;;  %v1623_v15 = vadd.f32 %v1195_v7, %v196_v62 }
  0x63   :  { %v1036_v43 = vpop.eup %1035  ;;  %1055 = vrcp.f32 %v514_v60  ;;  %v515_v14 = vadd.f32 1.0, %v1034_v19  ;;  %v1626_v18 = vadd.f32 %v1195_v7, %v197_v9  ;;  %v440_v61 = vmul.f32 1.442695, %v330_v11 }
  0x64   :  { %696 = vst [vmem:[%s1879_s3 + $0xe0] sm:$0xff] %v632_v56  ;;  %v633_v33 = vmul.f32 %v1036_v43, %v1445_v8  ;;  %1057 = vpow2.f32 %v430_v22  ;;  %v198_v7 = vmul.f32 %v1638_v55, %v837_v48  ;;  %v331_v20 = vsub.f32 0.0, %v1623_v15  ;;  %v1649_v8 = vld [vmem:[%s1878_s2] ss:$0 sm:$0xff] }
  0x65   :  { %1059 = vrcp.f32 %v515_v14  ;;  %v332_v16 = vsub.f32 0.0, %v1626_v18  ;;  %v840_v28 = vunpack.c.l.bf16 %v890_v52  ;;  %v841_v0 = vunpack.c.h.bf16 %v890_v52  ;;  %v893_v48 = vld [vmem:[%s1876_s0 + $0xe0] sm:$0xff]  }
  0x66   :  { %697 = vst [vmem:[%s1879_s3 + $0xe8] sm:$0xff] %v633_v33  ;;  %1061 = vpow2.f32 %v432_v29  ;;  %v1652_v22 = vadd.f32 %v1649_v8, %v198_v7  ;;  %v844_v42 = vunpack.c.l.bf16 %v891_v1  ;;  %v442_v34 = vmul.f32 1.442695, %v331_v20 }
  0x67   :  { %v1038_v21 = vpop.eup %1037  ;;  %1063 = vpow2.f32 %v434_v46  ;;  %v444_v35 = vmul.f32 1.442695, %v332_v16  ;;  %v199_v4 = vmul.f32 %v1638_v55, %v840_v28  ;;  %v200_v38 = vmul.f32 %v1638_v55, %v841_v0 }
  0x68   :  { %v1040_v45 = vpop.eup %1039  ;;  %v634_v25 = vmul.f32 %v1038_v21, %v1448_v36  ;;  %1065 = vpow2.f32 %v436_v30  ;;  %v333_v29 = vsub.f32 0.0, %v1652_v22  ;;  %v201_v46 = vmul.f32 %v1638_v55, %v844_v42 }
  0x69   :  { %v1042_v5 = vpop.eup %1041  ;;  %v635_v39 = vmul.f32 %v1040_v45, %v1458_v51  ;;  %1067 = vpow2.f32 %v438_v13  ;;  %v1660_v40 = vadd.f32 %v1649_v8, %v199_v4  ;;  %v1668_v27 = vadd.f32 %v1649_v8, %v200_v38 }
  0x6a   :  { %v1044_v26 = vpop.eup %1043  ;;  %698 = vst [vmem:[%s1879_s3 + $0xf0] sm:$0xff] %v634_v25  ;;  %v636_v36 = vmul.f32 %v1042_v5, %v1467_v17  ;;  %1069 = vpow2.f32 %v440_v61  ;;  %v446_v2 = vmul.f32 1.442695, %v333_v29  ;;  %v1676_v30 = vadd.f32 %v1649_v8, %v201_v46  ;;  %v892_v17 = vld [vmem:[%s1876_s0 + $0xd8] sm:$0xff]   ;;  %v894_v25 = vld [vmem:[%s1876_s0 + $0xe8] sm:$0xff]  }
  0x6b   :  { %v1046_v44 = vpop.eup %1045  ;;  %699 = vst [vmem:[%s1879_s3 + $0xf8] sm:$0xff] %v635_v39  ;;  %v637_v51 = vmul.f32 %v1044_v26, %v1471_v23  ;;  %1071 = vpow2.f32 %v442_v34  ;;  %v334_v47 = vsub.f32 0.0, %v1660_v40  ;;  %v335_v23 = vsub.f32 0.0, %v1668_v27 }
  0x6c   :  { %v1048_v50 = vpop.eup %1047  ;;  %700 = vst [vmem:[%s1879_s3 + $0x100] sm:$0xff] %v636_v36  ;;  %v638_v31 = vmul.f32 %v1046_v44, %v1481_v32  ;;  %1073 = vpow2.f32 %v444_v35  ;;  %v845_v53 = vunpack.c.h.bf16 %v891_v1  ;;  %v336_v62 = vsub.f32 0.0, %v1676_v30 }
  0x6d   :  { %v1050_v13 = vpop.eup %1049  ;;  %701 = vst [vmem:[%s1879_s3 + $0x108] sm:$0xff] %v637_v51  ;;  %v639_v59 = vmul.f32 %v1048_v50, %v1495_v41  ;;  %1075 = vpow2.f32 %v446_v2  ;;  %v448_v60 = vmul.f32 1.442695, %v334_v47  ;;  %v450_v19 = vmul.f32 1.442695, %v335_v23 }
  0x6e   :  { %v1052_v9 = vpop.eup %1051  ;;  %702 = vst [vmem:[%s1879_s3 + $0x110] sm:$0xff] %v638_v31  ;;  %v516_v32 = vadd.f32 1.0, %v1050_v13  ;;  %v202_v56 = vmul.f32 %v1638_v55, %v845_v53  ;;  %v848_v11 = vunpack.c.l.bf16 %v892_v17  ;;  %v452_v43 = vmul.f32 1.442695, %v336_v62  ;;  %v895_v62 = vld [vmem:[%s1876_s0 + $0xf0] sm:$0xff]  }
  0x6f   :  { %v1054_v52 = vpop.eup %1053  ;;  %703 = vst [vmem:[%s1879_s3 + $0x118] sm:$0xff] %v639_v59  ;;  %v640_v41 = vmul.f32 %v1052_v9, %v1504_v10  ;;  %1077 = vpow2.f32 %v448_v60  ;;  %v849_v14 = vunpack.c.h.bf16 %v892_v17  ;;  %v852_v28 = vunpack.c.l.bf16 %v893_v48 }
  0x70   :  { %v1056_v1 = vpop.eup %1055  ;;  %v641_v33 = vmul.f32 %v1054_v52, %v1511_v58  ;;  %1079 = vrcp.f32 %v516_v32  ;;  %v1704_v61 = vadd.f32 %v1649_v8, %v202_v56  ;;  %v203_v7 = vmul.f32 %v1638_v55, %v848_v11 }
  0x71   :  { %v1058_v20 = vpop.eup %1057  ;;  %704 = vst [vmem:[%s1879_s3 + $0x120] sm:$0xff] %v640_v41  ;;  %v642_v16 = vmul.f32 %v1056_v1, %v1514_v12  ;;  %1081 = vpow2.f32 %v450_v19  ;;  %v204_v10 = vmul.f32 %v1638_v55, %v849_v14  ;;  %v205_v4 = vmul.f32 %v1638_v55, %v852_v28 }
  0x72   :  { %v1060_v0 = vpop.eup %1059  ;;  %705 = vst [vmem:[%s1879_s3 + $0x128] sm:$0xff] %v641_v33  ;;  %v517_v58 = vadd.f32 1.0, %v1058_v20  ;;  %1083 = vpow2.f32 %v452_v43  ;;  %v337_v42 = vsub.f32 0.0, %v1704_v61  ;;  %v1717_v21 = vadd.f32 %v1649_v8, %v203_v7 }
  0x73   :  { %v1062_v34 = vpop.eup %1061  ;;  %706 = vst [vmem:[%s1879_s3 + $0x130] sm:$0xff] %v642_v16  ;;  %v643_v12 = vmul.f32 %v1060_v0, %v1536_v3  ;;  %v1724_v35 = vadd.f32 %v1649_v8, %v204_v10  ;;  %v853_v45 = vunpack.c.h.bf16 %v893_v48  ;;  %v1736_v26 = vadd.f32 %v1649_v8, %v205_v4 }
  0x74   :  { %v1064_v29 = vpop.eup %1063  ;;  %1085 = vrcp.f32 %v517_v58  ;;  %v518_v38 = vadd.f32 1.0, %v1062_v34  ;;  %v338_v5 = vsub.f32 0.0, %v1717_v21  ;;  %v454_v51 = vmul.f32 1.442695, %v337_v42  ;;  %v896_v42 = vld [vmem:[%s1876_s0 + $0xf8] sm:$0xff]  }
  0x75   :  { %v1066_v39 = vpop.eup %1065  ;;  %707 = vst [vmem:[%s1879_s3 + $0x138] sm:$0xff] %v643_v12  ;;  %v519_v3 = vadd.f32 1.0, %v1064_v29  ;;  %v339_v46 = vsub.f32 0.0, %v1724_v35  ;;  %v206_v36 = vmul.f32 %v1638_v55, %v853_v45  ;;  %v856_v47 = vunpack.c.l.bf16 %v894_v25 }
  0x76   :  { %v1068_v2 = vpop.eup %1067  ;;  %1087 = vrcp.f32 %v518_v38  ;;  %v520_v44 = vadd.f32 1.0, %v1066_v39  ;;  %v456_v31 = vmul.f32 1.442695, %v338_v5  ;;  %v340_v23 = vsub.f32 0.0, %v1736_v26 }
  0x77   :  { %v1070_v17 = vpop.eup %1069  ;;  %1089 = vrcp.f32 %v519_v3  ;;  %v521_v50 = vadd.f32 1.0, %v1068_v2  ;;  %v1741_v59 = vadd.f32 %v1649_v8, %v206_v36  ;;  %v207_v60 = vmul.f32 %v1638_v55, %v856_v47 }
  0x78   :  { %v1072_v53 = vpop.eup %1071  ;;  %1091 = vrcp.f32 %v520_v44  ;;  %v522_v13 = vadd.f32 1.0, %v1070_v17  ;;  %v458_v19 = vmul.f32 1.442695, %v339_v46  ;;  %v857_v56 = vunpack.c.h.bf16 %v894_v25 }
  0x79   :  { %v1074_v9 = vpop.eup %1073  ;;  %1093 = vrcp.f32 %v521_v50  ;;  %v523_v32 = vadd.f32 1.0, %v1072_v53  ;;  %v341_v52 = vsub.f32 0.0, %v1741_v59  ;;  %v1749_v41 = vadd.f32 %v1649_v8, %v207_v60 }
  0x7a   :  { %v1076_v11 = vpop.eup %1075  ;;  %1095 = vrcp.f32 %v522_v13  ;;  %v524_v48 = vadd.f32 1.0, %v1074_v9  ;;  %v208_v14 = vmul.f32 %v1638_v55, %v857_v56  ;;  %v860_v1 = vunpack.c.l.bf16 %v895_v62 }
  0x7b   :  { %1097 = vrcp.f32 %v523_v32  ;;  %v525_v43 = vadd.f32 1.0, %v1076_v11  ;;  %v460_v7 = vmul.f32 1.442695, %v340_v23  ;;  %v342_v20 = vsub.f32 0.0, %v1749_v41 }
  0x7c   :  { %v1078_v33 = vpop.eup %1077  ;;  %1099 = vrcp.f32 %v524_v48  ;;  %v861_v16 = vunpack.c.h.bf16 %v895_v62  ;;  %v1754_v0 = vadd.f32 %v1649_v8, %v208_v14  ;;  %v209_v58 = vmul.f32 %v1638_v55, %v860_v1 }
  0x7d   :  { %v1080_v10 = vpop.eup %1079  ;;  %1101 = vrcp.f32 %v525_v43  ;;  %v526_v28 = vadd.f32 1.0, %v1078_v33  ;;  %v462_v4 = vmul.f32 1.442695, %v341_v52  ;;  %v864_v3 = vunpack.c.l.bf16 %v896_v42 }
  0x7e   :  { %v1082_v34 = vpop.eup %1081  ;;  %v644_v12 = vmul.f32 %v1080_v10, %v1560_v49  ;;  %1103 = vpow2.f32 %v454_v51  ;;  %v210_v45 = vmul.f32 %v1638_v55, %v861_v16  ;;  %v343_v38 = vsub.f32 0.0, %v1754_v0 }
  0x7f   :  { %v1084_v25 = vpop.eup %1083  ;;  %1105 = vrcp.f32 %v526_v28  ;;  %v527_v29 = vadd.f32 1.0, %v1082_v34  ;;  %v1764_v5 = vadd.f32 %v1649_v8, %v209_v58  ;;  %v464_v36 = vmul.f32 1.442695, %v342_v20 }
  0x80   :  { %708 = vst [vmem:[%s1879_s3 + $0x140] sm:$0xff] %v644_v12  ;;  %v528_v39 = vadd.f32 1.0, %v1084_v25  ;;  %1107 = vpow2.f32 %v456_v31  ;;  %v1770_v49 = vadd.f32 %v1649_v8, %v210_v45  ;;  %v865_v44 = vunpack.c.h.bf16 %v896_v42 }
  0x81   :  { %v1086_v46 = vpop.eup %1085  ;;  %1109 = vrcp.f32 %v527_v29  ;;  %v344_v2 = vsub.f32 0.0, %v1764_v5  ;;  %v211_v17 = vmul.f32 %v1638_v55, %v864_v3  ;;  %v466_v31 = vmul.f32 1.442695, %v343_v38 }
  0x82   :  { %v645_v51 = vmul.f32 %v1086_v46, %v1571_v54  ;;  %1111 = vrcp.f32 %v528_v39  ;;  %v345_v47 = vsub.f32 0.0, %v1770_v49  ;;  %v212_v23 = vmul.f32 %v1638_v55, %v865_v44 }
  0x83   :  { %v1088_v50 = vpop.eup %1087  ;;  %1113 = vpow2.f32 %v458_v19  ;;  %v468_v60 = vmul.f32 1.442695, %v344_v2  ;;  %v1782_v54 = vadd.f32 %v1649_v8, %v211_v17 }
  0x84   :  { %v1090_v53 = vpop.eup %1089  ;;  %709 = vst [vmem:[%s1879_s3 + $0x148] sm:$0xff] %v645_v51  ;;  %v646_v13 = vmul.f32 %v1088_v50, %v1576_v6  ;;  %1115 = vpow2.f32 %v460_v7  ;;  %v470_v32 = vmul.f32 1.442695, %v345_v47  ;;  %v1786_v19 = vadd.f32 %v1649_v8, %v212_v23 }
  0x85   :  { %v1092_v62 = vpop.eup %1091  ;;  %v647_v9 = vmul.f32 %v1090_v53, %v1592_v63  ;;  %1117 = vpow2.f32 %v462_v4  ;;  %v346_v56 = vsub.f32 0.0, %v1782_v54 }
  0x86   :  { %v1094_v55 = vpop.eup %1093  ;;  %710 = vst [vmem:[%s1879_s3 + $0x150] sm:$0xff] %v646_v13  ;;  %v648_v6 = vmul.f32 %v1092_v62, %v1601_v24  ;;  %1119 = vpow2.f32 %v464_v36  ;;  %v347_v8 = vsub.f32 0.0, %v1786_v19 }
  0x87   :  { %v1096_v11 = vpop.eup %1095  ;;  %711 = vst [vmem:[%s1879_s3 + $0x158] sm:$0xff] %v647_v9  ;;  %v649_v63 = vmul.f32 %v1094_v55, %v1604_v37  ;;  %1121 = vpow2.f32 %v466_v31  ;;  %v472_v52 = vmul.f32 1.442695, %v346_v56 }
  0x88   :  { %v1098_v48 = vpop.eup %1097  ;;  %712 = vst [vmem:[%s1879_s3 + $0x160] sm:$0xff] %v648_v6  ;;  %v650_v24 = vmul.f32 %v1096_v11, %v1613_v57  ;;  %1123 = vpow2.f32 %v468_v60  ;;  %v474_v37 = vmul.f32 1.442695, %v347_v8 }
  0x89   :  { %v1100_v43 = vpop.eup %1099  ;;  %713 = vst [vmem:[%s1879_s3 + $0x168] sm:$0xff] %v649_v63  ;;  %v651_v14 = vmul.f32 %v1098_v48, %v1623_v15  ;;  %1125 = vpow2.f32 %v470_v32 }
  0x8a   :  { %v1102_v1 = vpop.eup %1101  ;;  %714 = vst [vmem:[%s1879_s3 + $0x170] sm:$0xff] %v650_v24  ;;  %v652_v33 = vmul.f32 %v1100_v43, %v1626_v18  ;;  %1127 = vpow2.f32 %v472_v52 }
  0x8b   :  { %v1104_v57 = vpop.eup %1103  ;;  %715 = vst [vmem:[%s1879_s3 + $0x178] sm:$0xff] %v651_v14  ;;  %v653_v7 = vmul.f32 %v1102_v1, %v1652_v22  ;;  %1129 = vpow2.f32 %v474_v37 }
  0x8c   :  { %v1106_v20 = vpop.eup %1105  ;;  %716 = vst [vmem:[%s1879_s3 + $0x180] sm:$0xff] %v652_v33  ;;  %v529_v15 = vadd.f32 1.0, %v1104_v57 }
  0x8d   :  { %v1108_v16 = vpop.eup %1107  ;;  %717 = vst [vmem:[%s1879_s3 + $0x188] sm:$0xff] %v653_v7  ;;  %v654_v18 = vmul.f32 %v1106_v20, %v1660_v40 }
  0x8e   :  { %v1110_v10 = vpop.eup %1109  ;;  %1131 = vrcp.f32 %v529_v15  ;;  %v530_v28 = vadd.f32 1.0, %v1108_v16 }
  0x8f   :  { %v1112_v58 = vpop.eup %1111  ;;  %718 = vst [vmem:[%s1879_s3 + $0x190] sm:$0xff] %v654_v18  ;;  %v655_v22 = vmul.f32 %v1110_v10, %v1668_v27 }
  0x90   :  { %v1114_v42 = vpop.eup %1113  ;;  %v656_v34 = vmul.f32 %v1112_v58, %v1676_v30  ;;  %1133 = vrcp.f32 %v530_v28 }
  0x91   :  { %v1116_v12 = vpop.eup %1115  ;;  %719 = vst [vmem:[%s1879_s3 + $0x198] sm:$0xff] %v655_v22  ;;  %v531_v40 = vadd.f32 1.0, %v1114_v42 }
  0x92   :  { %v1118_v4 = vpop.eup %1117  ;;  %720 = vst [vmem:[%s1879_s3 + $0x1a0] sm:$0xff] %v656_v34  ;;  %v532_v45 = vadd.f32 1.0, %v1116_v12 }
  0x93   :  { %v1120_v25 = vpop.eup %1119  ;;  %1135 = vrcp.f32 %v531_v40  ;;  %v533_v29 = vadd.f32 1.0, %v1118_v4 }
  0x94   :  { %v1122_v27 = vpop.eup %1121  ;;  %1137 = vrcp.f32 %v532_v45  ;;  %v534_v38 = vadd.f32 1.0, %v1120_v25 }
  0x95   :  { %v1124_v30 = vpop.eup %1123  ;;  %1139 = vrcp.f32 %v533_v29  ;;  %v535_v39 = vadd.f32 1.0, %v1122_v27 }
  0x96   :  { %v1126_v3 = vpop.eup %1125  ;;  %1141 = vrcp.f32 %v534_v38  ;;  %v536_v46 = vadd.f32 1.0, %v1124_v30 }
  0x97   :  { %v1128_v36 = vpop.eup %1127  ;;  %1143 = vrcp.f32 %v535_v39  ;;  %v537_v2 = vadd.f32 1.0, %v1126_v3 }
  0x98   :  { %v1130_v44 = vpop.eup %1129  ;;  %1145 = vrcp.f32 %v536_v46  ;;  %v538_v51 = vadd.f32 1.0, %v1128_v36 }
  0x99   :  { %1147 = vrcp.f32 %v537_v2  ;;  %v539_v47 = vadd.f32 1.0, %v1130_v44 }
  0x9a   :  { %1149 = vrcp.f32 %v538_v51 }
  0x9b   :  { %v1132_v17 = vpop.eup %1131  ;;  %1151 = vrcp.f32 %v539_v47 }
  0x9c   :  { %v657_v50 = vmul.f32 %v1132_v17, %v1704_v61 }
  0x9d   :  { %v1134_v31 = vpop.eup %1133 }
  0x9e   :  { %721 = vst [vmem:[%s1879_s3 + $0x1a8] sm:$0xff] %v657_v50  ;;  %v658_v23 = vmul.f32 %v1134_v31, %v1717_v21 }
  0xa0   :  { %v1136_v53 = vpop.eup %1135  ;;  %722 = vst [vmem:[%s1879_s3 + $0x1b0] sm:$0xff] %v658_v23 }
  0xa1   :  { %v1138_v13 = vpop.eup %1137  ;;  %v659_v60 = vmul.f32 %v1136_v53, %v1724_v35 }
  0xa2   :  { %v1140_v62 = vpop.eup %1139  ;;  %v660_v9 = vmul.f32 %v1138_v13, %v1736_v26 }
  0xa3   :  { %v1142_v32 = vpop.eup %1141  ;;  %723 = vst [vmem:[%s1879_s3 + $0x1b8] sm:$0xff] %v659_v60  ;;  %v661_v61 = vmul.f32 %v1140_v62, %v1741_v59 }
  0xa4   :  { %v1144_v55 = vpop.eup %1143  ;;  %724 = vst [vmem:[%s1879_s3 + $0x1c0] sm:$0xff] %v660_v9  ;;  %v662_v21 = vmul.f32 %v1142_v32, %v1749_v41 }
  0xa5   :  { %v1146_v6 = vpop.eup %1145  ;;  %725 = vst [vmem:[%s1879_s3 + $0x1c8] sm:$0xff] %v661_v61  ;;  %v663_v35 = vmul.f32 %v1144_v55, %v1754_v0 }
  0xa6   :  { %v1148_v26 = vpop.eup %1147  ;;  %726 = vst [vmem:[%s1879_s3 + $0x1d0] sm:$0xff] %v662_v21  ;;  %v664_v59 = vmul.f32 %v1146_v6, %v1764_v5 }
  0xa7   :  { %v1150_v56 = vpop.eup %1149  ;;  %727 = vst [vmem:[%s1879_s3 + $0x1d8] sm:$0xff] %v663_v35  ;;  %v665_v41 = vmul.f32 %v1148_v26, %v1770_v49 }
  0xa8   :  { %v1152_v11 = vpop.eup %1151  ;;  %728 = vst [vmem:[%s1879_s3 + $0x1e0] sm:$0xff] %v664_v59  ;;  %v666_v0 = vmul.f32 %v1150_v56, %v1782_v54 }
  0xa9   :  { %729 = vst [vmem:[%s1879_s3 + $0x1e8] sm:$0xff] %v665_v41  ;;  %v667_v5 = vmul.f32 %v1152_v11, %v1786_v19 }
  0xaa   :  { %730 = vst [vmem:[%s1879_s3 + $0x1f0] sm:$0xff] %v666_v0 }
  0xab   :  { %731 = vst [vmem:[%s1879_s3 + $0x1f8] sm:$0xff] %v667_v5 }

// kernel: conv_bn_act.2
= control target key start
LH: loop header
LB: loop body
LE: loop exit
PB: predicated region body
PF: predicated region fallthrough
CT: control target
= control target key end

     0   :  { %s2301_s12 = smov 0   ;;  %s2303_s13 = smov 0   ;;  %s3049_s0 = inlined_call_operand.vmem [shape: bf16[2,18,18,4], index: 0, kind: input, shape index: {}]   ;;  %s3050_s1 = inlined_call_operand.vmem [shape: bf16[36,128], index: 1, kind: input, shape index: {}]   ;;  %s3051_s2 = inlined_call_operand.vmem [shape: bf16[512,128], index: 2, kind: output, shape index: {0}]   ;;  %s3052_s3 = inlined_call_operand.vmem [shape: f32[16,128], index: 3, kind: output, shape index: {1}]  }
   0x1   :  { %s2305_s14 = smov 0  }
   0x2 LB: > { %s26_s15 = sadd.s32 1, %s2267_s13  ;;  %p1891_p0 = scmp.ge.s32.totalorder %s2271_s14, 1  ;;  %s2271_s14 = sphi %s2305_s14, %s14_s14   ;;  %s2267_s13 = sphi %s2303_s13, %s3054_s13   ;;  %s2263_s12 = sphi %s2301_s12, %s3053_s12  }
   0x3   : > { %p28_p1 = scmp.ge.s32.totalorder %s26_s15, 2  ;;  %p156_p2 = scmp.lt.s32.totalorder %s2271_s14, 3 }
   0x5   : > { %s3056_s15 = smov (%p28_p1, %s26_s15), 0  ;;  %p157_p3 = pnand %p1891_p0, %p156_p2 }
   0x6   : > { %p186_p4 = scmp.lt.s32.totalorder (!%p157_p3), %s2263_s12, 1  ;;  %s2273_s21 = smov (!%p157_p3), 12  }
   0x7   : > { %160 = sbr.rel (%p157_p3) target bundleno = 685 (0x2ad), region = 28  ;;  %s2274_s22 = smov (!%p157_p3), 20  }
   0x8   : > { %s2275_s23 = smov (!%p157_p3), 8   ;;  %s2276_s24 = smov (!%p157_p3), 4  }
   0x9   : > { %s2277_s25 = smov (!%p157_p3), 16   ;;  %s2278_s26 = smov (!%p157_p3), 24  }
   0xa   : > { %s2279_s27 = smov (!%p157_p3), 28   ;;  %s2280_s5 = smov (!%p157_p3), 32  }
   0xb   : > { %s1893_s8 = sshll.u32 (!%p157_p3), %s2263_s12, 5 }
   0xc   : > { %s2323_s16 = scalar_select %p186_p4, %s2263_s12, 1  ;;  %vm617_vm0 = vcmask 1046528   ;;  %vm392_vm1 = vsmask.f32 7424  ;;  %v2232_v49 = vld [vmem:[%s3050_s1 + $0x8] sm:$0xff]   ;;  %vm1253_vm2 = vcmask 1041408  }
   0xd   : > { %v2230_v45 = vld [vmem:[%s3050_s1 + $0x10] ss:$0 sps:$4 sm:$0x33]   ;;  %v2234_v54 = vld [vmem:[%s3050_s1] sm:$0xff]   ;;  %vm936_vm3 = vcmask 31744   ;;  %vm969_vm4 = vcmask 64512  }
   0xe   : > { %s2177_s17 = smul.u32 216, %s2323_s16  ;;  %2175 = vmatprep.subr.msk.bf16.mxu0 %vm1253_vm2, %v2230_v45  ;;  %v1255_v50 = vsel %vm1253_vm2, %v2230_v45, 0  ;;  %2176 = vmatprep.subr.msk.bf16.mxu1 %vm1253_vm2, %v2230_v45  ;;  %vm1002_vm5 = vcmask 97280   ;;  %vm1035_vm6 = vcmask 130048   ;;  %vm1068_vm7 = vcmask 162816   ;;  %p193_p5 = scmp.lt.s32.totalorder %s1893_s8, 63 }
   0xf   : > { %2132 = vmatpush3.bf16.msra.mxu0 %v1255_v50  ;;  %2172 = vmatpush3.bf16.msra.mxu1 %v1255_v50  ;;  %vm1101_vm8 = vcmask 195584   ;;  %vm1134_vm9 = vcmask 228352   ;;  %vm1167_vm10 = vcmask 261120   ;;  %vm1220_vm11 = vcmask 293888  }
  0x10   : > { %s2329_s20 = scalar_lea.vmem %s3049_s0, %s2177_s17  ;;  %2133 = vmatprep.subr.bf16.mxu0 %v2232_v49  ;;  %2170 = vmatprep.subr.bf16.mxu1 %v2232_v49  ;;  %s3058_s8 = smov (!%p193_p5, %s1893_s8), 63 }
  0x11   : > { %v2332_v0 = vld [vmem:[%s2329_s20 + $0x18] sm:$0xff]   ;;  %v2335_v1 = vld [vmem:[%s2329_s20 + $0xc] sm:$0xff]   ;;  %v2212_v2 = vld [vmem:[%s2329_s20 + $0x14] ss:$0 sps:$4 sm:$0x11]   ;;  %s1894_s9 = sshll.u32 %s3058_s8, 2 }
  0x12   : > { %705 = vrot.lane.b32.xlu1 %v2332_v0, %s2273_s21  ;;  %v2341_v3 = vld [vmem:[%s2329_s20] sm:$0xff]   ;;  %703 = vrot.lane.b32.xlu0 %v2335_v1, %s2273_s21  ;;  %v621_v4 = vrot.slane %v2335_v1, 1  ;;  %v622_v5 = vrot.slane %v2212_v2, 1  ;;  %v2214_v6 = vld [vmem:[%s2329_s20 + $0x8] ss:$0 sps:$4 sm:$0x11]   ;;  %s2804_s12 = scalar_lea.vmem %s3051_s2, %s1894_s9 }
  0x13   : > { %v618_v7 = vrot.slane %v2341_v3, 1  ;;  %v394_v8 = vshrl.u32 %v2341_v3, 16  ;;  %v396_v9 = vshll.u32 %v2341_v3, 16  ;;  %v406_v10 = vshrl.u32 %v2335_v1, 16  ;;  %v2361_v30 = vld [vmem:[%s2329_s20 + $0x24] sm:$0xff]   ;;  %v2388_v48 = vld [vmem:[%s2329_s20 + $0x30] sm:$0xff]   ;;  %2134 = vmatpush3.bf16.msra.mxu0 %v2232_v49  ;;  %2173 = vmatpush3.bf16.msra.mxu1 %v2232_v49 }
  0x14   : > { %v623_v11 = vsel %vm617_vm0, %v621_v4, %v622_v5  ;;  %v619_v12 = vrot.slane %v2214_v6, 1  ;;  %v401_v13 = vshll.u32 %v2214_v6, 16  ;;  %v2215_v14 = vld [vmem:[%s2329_s20 + $0x20] ss:$0 sps:$4 sm:$0x11]   ;;  %v408_v15 = vshll.u32 %v2335_v1, 16  ;;  %2135 = vmatprep.subr.bf16.mxu0 %v2234_v54  ;;  %2171 = vmatprep.subr.bf16.mxu1 %v2234_v54 }
  0x15   : > { %v398_v16 = vrot.slane %v396_v9, 1  ;;  %v413_v17 = vshll.u32 %v2212_v2, 16  ;;  %v420_v18 = vshll.u32 %v2332_v0, 16  ;;  %v624_v23 = vrot.slane %v2332_v0, 1  ;;  %v2407_v60 = vld [vmem:[%s2329_s20 + $0x3c] sm:$0xff]   ;;  %v2483_v49 = vld [vmem:[%s2329_s20 + $0x6c] sm:$0xff]  }
  0x16   : > { %785 = vrot.lane.b32.xlu0 %v623_v11, %s2274_s22  ;;  %v620_v19 = vsel %vm617_vm0, %v618_v7, %v619_v12  ;;  %v403_v20 = vrot.slane %v401_v13, 1  ;;  %v410_v21 = vrot.slane %v408_v15, 1  ;;  %v418_v25 = vshrl.u32 %v2332_v0, 16  ;;  %v2217_v33 = vld [vmem:[%s2329_s20 + $0x2c] ss:$0 sps:$4 sm:$0x11]  }
  0x17   : > { %666 = vrot.lane.b32.xlu1 %v620_v19, %s2275_s23  ;;  %v399_v22 = vor.u32 %v398_v16, %v394_v8  ;;  %v415_v24 = vrot.slane %v413_v17, 1  ;;  %v625_v26 = vrot.slane %v2215_v14, 1  ;;  %v422_v28 = vrot.slane %v420_v18, 1  ;;  %v2219_v52 = vld [vmem:[%s2329_s20 + $0x38] ss:$0 sps:$4 sm:$0x11]   ;;  %2136 = vmatpush3.bf16.msra.mxu0 %v2234_v54 }
  0x18   : > { %v411_v27 = vor.u32 %v410_v21, %v406_v10  ;;  %v425_v29 = vshll.u32 %v2215_v14, 16  ;;  %v432_v37 = vshll.u32 %v2361_v30, 16  ;;  %v430_v39 = vshrl.u32 %v2361_v30, 16  ;;  %2174 = vmatpush3.bf16.msra.mxu1 %v2234_v54  ;;  %v2221_v2 = vld [vmem:[%s2329_s20 + $0x44] ss:$0 sps:$4 sm:$0x11]  }
  0x19   : > { %v404_v31 = vsel %vm392_vm1, %v399_v22, %v403_v20  ;;  %v626_v34 = vsel %vm617_vm0, %v624_v23, %v625_v26  ;;  %v423_v35 = vor.u32 %v422_v28, %v418_v25  ;;  %v437_v41 = vshll.u32 %v2217_v33, 16  ;;  %v2432_v14 = vld [vmem:[%s2329_s20 + $0x48] sm:$0xff]   ;;  %v2223_v16 = vld [vmem:[%s2329_s20 + $0x50] ss:$0 sps:$4 sm:$0x11]   ;;  %v2445_v23 = vld [vmem:[%s2329_s20 + $0x54] sm:$0xff]  }
  0x1a   : > { %585 = vrot.lane.b32.xlu0 %v404_v31, %s2276_s24  ;;  %v416_v32 = vsel %vm392_vm1, %v411_v27, %v415_v24  ;;  %v427_v36 = vrot.slane %v425_v29, 1  ;;  %v434_v40 = vrot.slane %v432_v37, 1  ;;  %v627_v46 = vrot.slane %v2361_v30, 1  ;;  %v2225_v27 = vld [vmem:[%s2329_s20 + $0x5c] ss:$0 sps:$4 sm:$0x11]  }
  0x1b   : > { %668 = vrot.lane.b32.xlu1 %v623_v11, %s2275_s23  ;;  %v439_v43 = vrot.slane %v437_v41, 1  ;;  %v628_v47 = vrot.slane %v2217_v33, 1  ;;  %v444_v53 = vshll.u32 %v2388_v48, 16  ;;  %v442_v55 = vshrl.u32 %v2388_v48, 16  ;;  %s1895_s17 = sshll.u32 %s2323_s16, 3 }
  0x1c   : > { %v428_v38 = vsel %vm392_vm1, %v423_v35, %v427_v36  ;;  %v435_v42 = vor.u32 %v434_v40, %v430_v39  ;;  %v449_v57 = vshll.u32 %v2219_v52, 16  ;;  %v630_v62 = vrot.slane %v2388_v48, 1  ;;  %v2470_v39 = vld [vmem:[%s2329_s20 + $0x60] sm:$0xff]   ;;  %v2227_v41 = vld [vmem:[%s2329_s20 + $0x68] ss:$0 sps:$4 sm:$0x11]  }
  0x1d   : > { %v629_v51 = vsel %vm617_vm0, %v627_v46, %v628_v47  ;;  %v446_v56 = vrot.slane %v444_v53, 1  ;;  %v631_v63 = vrot.slane %v2219_v52, 1  ;;  %v456_v4 = vshll.u32 %v2407_v60, 16  ;;  %v2229_v53 = vld [vmem:[%s2329_s20 + $0x74] ss:$0 sps:$4 sm:$0x11]  }
  0x1e   : > { %587 = vrot.lane.b32.xlu0 %v416_v32, %s2276_s24  ;;  %v440_v44 = vsel %vm392_vm1, %v435_v42, %v439_v43  ;;  %v451_v59 = vrot.slane %v449_v57, 1  ;;  %v454_v6 = vshrl.u32 %v2407_v60, 16  ;;  %v461_v8 = vshll.u32 %v2221_v2, 16 }
  0x1f   : > { %787 = vrot.lane.b32.xlu1 %v626_v34, %s2274_s22  ;;  %v447_v58 = vor.u32 %v446_v56, %v442_v55  ;;  %v632_v5 = vsel %vm617_vm0, %v630_v62, %v631_v63  ;;  %v458_v7 = vrot.slane %v456_v4, 1  ;;  %v633_v12 = vrot.slane %v2407_v60, 1 }
  0x20   : > { %v463_v10 = vrot.slane %v461_v8, 1  ;;  %v634_v13 = vrot.slane %v2221_v2, 1  ;;  %v468_v17 = vshll.u32 %v2432_v14, 16  ;;  %v466_v18 = vshrl.u32 %v2432_v14, 16 }
  0x21   : > { %v452_v61 = vsel %vm392_vm1, %v447_v58, %v451_v59  ;;  %v459_v9 = vor.u32 %v458_v7, %v454_v6  ;;  %v473_v20 = vshll.u32 %v2223_v16, 16  ;;  %v636_v25 = vrot.slane %v2432_v14, 1 }
  0x22   : > { %750 = vrot.lane.b32.xlu0 %v416_v32, %s2277_s25  ;;  %v635_v15 = vsel %vm617_vm0, %v633_v12, %v634_v13  ;;  %v470_v19 = vrot.slane %v468_v17, 1  ;;  %v637_v26 = vrot.slane %v2223_v16, 1  ;;  %v480_v28 = vshll.u32 %v2445_v23, 16  ;;  %v2233_v13 = vld [vmem:[%s2329_s20 + $0x80] ss:$0 sps:$4 sm:$0x11]  }
  0x23   : > { %752 = vrot.lane.b32.xlu1 %v428_v38, %s2277_s25  ;;  %v464_v11 = vsel %vm392_vm1, %v459_v9, %v463_v10  ;;  %v475_v22 = vrot.slane %v473_v20, 1  ;;  %v478_v31 = vshrl.u32 %v2445_v23, 16  ;;  %v485_v33 = vshll.u32 %v2225_v27, 16  ;;  %v2508_v9 = vld [vmem:[%s2329_s20 + $0x78] sm:$0xff]  }
  0x24   : > { %v471_v21 = vor.u32 %v470_v19, %v466_v18  ;;  %v638_v29 = vsel %vm617_vm0, %v636_v25, %v637_v26  ;;  %v482_v32 = vrot.slane %v480_v28, 1  ;;  %v639_v37 = vrot.slane %v2445_v23, 1  ;;  %v2526_v28 = vld [vmem:[%s2329_s20 + $0x84] sm:$0xff]  }
  0x25   : > { %v487_v35 = vrot.slane %v485_v33, 1  ;;  %v492_v42 = vshll.u32 %v2470_v39, 16  ;;  %v490_v43 = vshrl.u32 %v2470_v39, 16  ;;  %v497_v45 = vshll.u32 %v2227_v41, 16 }
  0x26   : > { %822 = vrot.lane.b32.xlu0 %v2332_v0, %s2278_s26  ;;  %v476_v24 = vsel %vm392_vm1, %v471_v21, %v475_v22  ;;  %v643_v52 = vrot.slane %v2227_v41, 1  ;;  %v504_v54 = vshll.u32 %v2483_v49, 16  ;;  %v502_v56 = vshrl.u32 %v2483_v49, 16 }
  0x27   : > { %824 = vrot.lane.b32.xlu1 %v2361_v30, %s2278_s26  ;;  %v499_v47 = vrot.slane %v497_v45, 1  ;;  %v509_v58 = vshll.u32 %v2229_v53, 16  ;;  %v645_v6 = vrot.slane %v2483_v49, 1  ;;  %v646_v7 = vrot.slane %v2229_v53, 1 }
  0x28   : > { %v506_v57 = vrot.slane %v504_v54, 1  ;;  %v514_v19 = vshrl.u32 %v2508_v9, 16  ;;  %v521_v21 = vshll.u32 %v2233_v13, 16  ;;  %v648_v33 = vrot.slane %v2508_v9, 1 }
  0x29   : > { %v511_v63 = vrot.slane %v509_v58, 1  ;;  %v526_v45 = vshrl.u32 %v2526_v28, 16 }
  0x2a   : > { %869 = vrot.lane.b32.xlu0 %v428_v38, %s2279_s27  ;;  %v507_v62 = vor.u32 %v506_v57, %v502_v56 }
  0x2b   : > { %871 = vrot.lane.b32.xlu1 %v440_v44, %s2279_s27 }
  0x2c   : > { %v512_v4 = vsel %vm392_vm1, %v507_v62, %v511_v63 }
  0x2e   : > { %904 = vrot.lane.b32.xlu0 %v626_v34, %s2280_s5 }
  0x2f   : > { %589 = vrot.lane.b32.xlu1 %v428_v38, %s2276_s24  ;;  %v640_v38 = vrot.slane %v2225_v27, 1 }
  0x31   : > { %v641_v40 = vsel %vm617_vm0, %v639_v37, %v640_v38  ;;  %v649_v37 = vrot.slane %v2233_v13, 1  ;;  %v2236_v38 = vld [vmem:[%s2329_s20 + $0x8c] ss:$0 sps:$4 sm:$0x11]  }
  0x32   : > { %906 = vrot.lane.b32.xlu0 %v629_v51, %s2280_s5 }
  0x33   : > { %591 = vrot.lane.b32.xlu1 %v440_v44, %s2276_s24 }
  0x36   : > { %670 = vrot.lane.b32.xlu0 %v626_v34, %s2275_s23  ;;  %v483_v34 = vor.u32 %v482_v32, %v478_v31 }
  0x37   : > { %672 = vrot.lane.b32.xlu1 %v629_v51, %s2275_s23 }
  0x38   : > { %v488_v36 = vsel %vm392_vm1, %v483_v34, %v487_v35 }
  0x3a   : > { %707 = vrot.lane.b32.xlu0 %v2361_v30, %s2273_s21 }
  0x3b   : > { %709 = vrot.lane.b32.xlu1 %v2388_v48, %s2273_s21 }
  0x3e   : > { %754 = vrot.lane.b32.xlu0 %v440_v44, %s2277_s25  ;;  %v494_v44 = vrot.slane %v492_v42, 1 }
  0x3f   : > { %756 = vrot.lane.b32.xlu1 %v452_v61, %s2277_s25 }
  0x40   : > { %v495_v46 = vor.u32 %v494_v44, %v490_v43 }
  0x42   : > { %789 = vrot.lane.b32.xlu0 %v629_v51, %s2274_s22  ;;  %v500_v50 = vsel %vm392_vm1, %v495_v46, %v499_v47  ;;  %v642_v51 = vrot.slane %v2470_v39, 1 }
  0x43   : > { %791 = vrot.lane.b32.xlu1 %v632_v5, %s2274_s22 }
  0x44   : > { %v644_v55 = vsel %vm617_vm0, %v642_v51, %v643_v52  ;;  %v533_v52 = vshll.u32 %v2236_v38, 16 }
  0x46   : > { %826 = vrot.lane.b32.xlu0 %v2388_v48, %s2278_s26 }
  0x47   : > { %828 = vrot.lane.b32.xlu1 %v2407_v60, %s2278_s26 }
  0x4a   : > { %873 = vrot.lane.b32.xlu0 %v452_v61, %s2279_s27 }
  0x4b   : > { %875 = vrot.lane.b32.xlu1 %v464_v11, %s2279_s27 }
  0x4e   : > { %908 = vrot.lane.b32.xlu0 %v632_v5, %s2280_s5 }
  0x4f   : > { %593 = vrot.lane.b32.xlu1 %v452_v61, %s2276_s24 }
  0x52   : > { %910 = vrot.lane.b32.xlu0 %v635_v15, %s2280_s5 }
  0x53   : > { %595 = vrot.lane.b32.xlu1 %v464_v11, %s2276_s24 }
  0x56   : > { %674 = vrot.lane.b32.xlu0 %v632_v5, %s2275_s23 }
  0x57   : > { %676 = vrot.lane.b32.xlu1 %v635_v15, %s2275_s23 }
  0x5a   : > { %711 = vrot.lane.b32.xlu0 %v2407_v60, %s2273_s21 }
  0x5b   : > { %713 = vrot.lane.b32.xlu1 %v2432_v14, %s2273_s21 }
  0x5e   : > { %758 = vrot.lane.b32.xlu0 %v464_v11, %s2277_s25  ;;  %v647_v11 = vsel %vm617_vm0, %v645_v6, %v646_v7  ;;  %v651_v6 = vrot.slane %v2526_v28, 1  ;;  %v652_v7 = vrot.slane %v2236_v38, 1 }
  0x5f   : > { %760 = vrot.lane.b32.xlu1 %v476_v24, %s2277_s25 }
  0x62   : > { %793 = vrot.lane.b32.xlu0 %v635_v15, %s2274_s22  ;;  %v516_v15 = vshll.u32 %v2508_v9, 16 }
  0x63   : > { %795 = vrot.lane.b32.xlu1 %v638_v29, %s2274_s22 }
  0x64   : > { %v518_v20 = vrot.slane %v516_v15, 1  ;;  %v2238_v15 = vld [vmem:[%s2329_s20 + $0x98] ss:$0 sps:$4 sm:$0x11]  }
  0x66   : > { %830 = vrot.lane.b32.xlu0 %v2432_v14, %s2278_s26  ;;  %v519_v27 = vor.u32 %v518_v20, %v514_v19 }
  0x67   : > { %832 = vrot.lane.b32.xlu1 %v2445_v23, %s2278_s26 }
  0x6a   : > { %877 = vrot.lane.b32.xlu0 %v476_v24, %s2279_s27 }
  0x6b   : > { %879 = vrot.lane.b32.xlu1 %v488_v36, %s2279_s27 }
  0x6e   : > { %912 = vrot.lane.b32.xlu0 %v638_v29, %s2280_s5 }
  0x6f   : > { %597 = vrot.lane.b32.xlu1 %v476_v24, %s2276_s24 }
  0x72   : > { %914 = vrot.lane.b32.xlu0 %v641_v40, %s2280_s5 }
  0x73   : > { %599 = vrot.lane.b32.xlu1 %v488_v36, %s2276_s24 }
  0x76   : > { %678 = vrot.lane.b32.xlu0 %v638_v29, %s2275_s23 }
  0x77   : > { %680 = vrot.lane.b32.xlu1 %v641_v40, %s2275_s23 }
  0x7a   : > { %715 = vrot.lane.b32.xlu0 %v2445_v23, %s2273_s21 }
  0x7b   : > { %717 = vrot.lane.b32.xlu1 %v2470_v39, %s2273_s21 }
  0x7e   : > { %762 = vrot.lane.b32.xlu0 %v488_v36, %s2277_s25 }
  0x7f   : > { %764 = vrot.lane.b32.xlu1 %v500_v50, %s2277_s25 }
  0x82   : > { %797 = vrot.lane.b32.xlu0 %v641_v40, %s2274_s22  ;;  %v528_v40 = vshll.u32 %v2526_v28, 16 }
  0x83   : > { %799 = vrot.lane.b32.xlu1 %v644_v55, %s2274_s22 }
  0x84   : > { %v706_v59 = vpop.permute.xlu1 %705  ;;  %v704_v61 = vpop.permute.xlu0 %703  ;;  %v530_v51 = vrot.slane %v528_v40, 1 }
  0x86   : > { %834 = vrot.lane.b32.xlu0 %v2470_v39, %s2278_s26 }
  0x87   : > { %836 = vrot.lane.b32.xlu1 %v2483_v49, %s2278_s26 }
  0x88   : > { %v786_v2 = vpop.permute.xlu0 %785 }
  0x89   : > { %v667_v5 = vpop.permute.xlu1 %666 }
  0x8a   : > { %881 = vrot.lane.b32.xlu0 %v500_v50, %s2279_s27 }
  0x8b   : > { %883 = vrot.lane.b32.xlu1 %v512_v4, %s2279_s27 }
  0x8c   : > { %v586_v8 = vpop.permute.xlu0 %585 }
  0x8d   : > { %v669_v10 = vpop.permute.xlu1 %668  ;;  %v938_v17 = vsel %vm936_vm3, %v2341_v3, %v586_v8  ;;  %v523_v3 = vrot.slane %v521_v21, 1  ;;  %v545_v21 = vshll.u32 %v2238_v15, 16 }
  0x8e   : > { %916 = vrot.lane.b32.xlu0 %v644_v55, %s2280_s5  ;;  %v971_v25 = vsel %vm969_vm4, %v938_v17, %v667_v5 }
  0x8f   : > { %601 = vrot.lane.b32.xlu1 %v500_v50, %s2276_s24  ;;  %v1004_v32 = vsel %vm1002_vm5, %v971_v25, %v704_v61  ;;  %v524_v36 = vsel %vm392_vm1, %v519_v27, %v523_v3  ;;  %v650_v50 = vsel %vm617_vm0, %v648_v33, %v649_v37  ;;  %v535_v61 = vrot.slane %v533_v52, 1  ;;  %v2579_v27 = vld [vmem:[%s2329_s20 + $0x9c] sm:$0xff]  }
  0x90   : > { %v588_v12 = vpop.permute.xlu0 %587  ;;  %v552_v37 = vshll.u32 %v2579_v27, 16 }
  0x91   : > { %v788_v16 = vpop.permute.xlu1 %787  ;;  %v940_v24 = vsel %vm936_vm3, %v2335_v1, %v588_v12  ;;  %v653_v12 = vsel %vm617_vm0, %v651_v6, %v652_v7  ;;  %v657_v6 = vrot.slane %v2579_v27, 1 }
  0x92   : > { %918 = vrot.lane.b32.xlu0 %v647_v11, %s2280_s5  ;;  %v973_v29 = vsel %vm969_vm4, %v940_v24, %v669_v10  ;;  %v2566_v10 = vld [vmem:[%s2329_s20 + $0x90] sm:$0xff]  }
  0x93   : > { %603 = vrot.lane.b32.xlu1 %v512_v4, %s2276_s24  ;;  %v1006_v34 = vsel %vm1002_vm5, %v973_v29, %v706_v59  ;;  %v531_v59 = vor.u32 %v530_v51, %v526_v45  ;;  %v538_v19 = vshrl.u32 %v2566_v10, 16  ;;  %v550_v45 = vshrl.u32 %v2579_v27, 16 }
  0x94   : > { %v751_v18 = vpop.permute.xlu0 %750 }
  0x95   : > { %v753_v22 = vpop.permute.xlu1 %752  ;;  %v1037_v1 = vsel %vm1035_vm6, %v1004_v32, %v751_v18  ;;  %v654_v32 = vrot.slane %v2566_v10, 1 }
  0x96   : > { %682 = vrot.lane.b32.xlu0 %v644_v55, %s2275_s23  ;;  %v1070_v42 = vsel %vm1068_vm7, %v1037_v1, %v786_v2  ;;  %v1039_v43 = vsel %vm1035_vm6, %v1006_v34, %v753_v22  ;;  %v655_v1 = vrot.slane %v2238_v15, 1 }
  0x97   : > { %684 = vrot.lane.b32.xlu1 %v647_v11, %s2275_s23  ;;  %v1072_v55 = vsel %vm1068_vm7, %v1039_v43, %v788_v16  ;;  %v540_v16 = vshll.u32 %v2566_v10, 16 }
  0x98   : > { %v823_v26 = vpop.permute.xlu0 %822 }
  0x99   : > { %v825_v31 = vpop.permute.xlu1 %824  ;;  %v1103_v44 = vsel %vm1101_vm8, %v1070_v42, %v823_v26  ;;  %v542_v20 = vrot.slane %v540_v16, 1  ;;  %v547_v26 = vrot.slane %v545_v21, 1  ;;  %v2242_v16 = vld [vmem:[%s2329_s20 + $0xb0] ss:$0 sps:$4 sm:$0x11]  }
  0x9a   : > { %719 = vrot.lane.b32.xlu0 %v2483_v49, %s2273_s21  ;;  %v1105_v56 = vsel %vm1101_vm8, %v1072_v55, %v825_v31 }
  0x9b   : > { %721 = vrot.lane.b32.xlu1 %v2508_v9, %s2273_s21  ;;  %v543_v25 = vor.u32 %v542_v20, %v538_v19 }
  0x9c   : > { %v870_v35 = vpop.permute.xlu0 %869 }
  0x9d   : > { %v872_v41 = vpop.permute.xlu1 %871  ;;  %v1136_v46 = vsel %vm1134_vm9, %v1103_v44, %v870_v35  ;;  %v548_v35 = vsel %vm392_vm1, %v543_v25, %v547_v26  ;;  %v656_v44 = vsel %vm617_vm0, %v654_v32, %v655_v1 }
  0x9e   : > { %766 = vrot.lane.b32.xlu0 %v512_v4, %s2277_s25  ;;  %v1138_v57 = vsel %vm1134_vm9, %v1105_v56, %v872_v41  ;;  %v536_v4 = vsel %vm392_vm1, %v531_v59, %v535_v61 }
  0x9f   : > { %768 = vrot.lane.b32.xlu1 %v524_v36, %s2277_s25 }
  0xa0   : > { %v905_v47 = vpop.permute.xlu0 %904 }
  0xa1   : > { %v590_v53 = vpop.permute.xlu1 %589  ;;  %v1169_v54 = vsel %vm1167_vm10, %v1136_v46, %v905_v47 }
  0xa2   : > { %801 = vrot.lane.b32.xlu0 %v647_v11, %s2274_s22  ;;  %2137 = vmatprep.mubr.msk.bf16.mxu0 %vm1220_vm11, %v1169_v54  ;;  %v942_v29 = vsel %vm936_vm3, %v2332_v0, %v590_v53 }
  0xa3   : > { %803 = vrot.lane.b32.xlu1 %v650_v50, %s2274_s22 }
  0xa4   : > { %v907_v58 = vpop.permute.xlu0 %906 }
  0xa5   : > { %v592_v62 = vpop.permute.xlu1 %591  ;;  %v1171_v63 = vsel %vm1167_vm10, %v1138_v57, %v907_v58 }
  0xa6   : > { %838 = vrot.lane.b32.xlu0 %v2508_v9, %s2278_s26  ;;  %2138 = vmatmul.mubr.msk.bf16.vlgmr.msra.gmra.mxu0 %vm1220_vm11, %v1171_v63  ;;  %v944_v40 = vsel %vm936_vm3, %v2361_v30, %v592_v62  ;;  %v554_v30 = vrot.slane %v552_v37, 1 }
  0xa7   : > { %840 = vrot.lane.b32.xlu1 %v2526_v28, %s2278_s26 }
  0xa8   : > { %v671_v2 = vpop.permute.xlu0 %670  ;;  %v555_v59 = vor.u32 %v554_v30, %v550_v45 }
  0xa9   : > { %v673_v5 = vpop.permute.xlu1 %672  ;;  %v975_v31 = vsel %vm969_vm4, %v942_v29, %v671_v2  ;;  %v2637_v29 = vld [vmem:[%s2329_s20 + $0xb4] sm:$0xff]  }
  0xaa   : > { %885 = vrot.lane.b32.xlu0 %v524_v36, %s2279_s27  ;;  %v977_v42 = vsel %vm969_vm4, %v944_v40, %v673_v5 }
  0xab   : > { %887 = vrot.lane.b32.xlu1 %v536_v4, %s2279_s27 }
  0xac   : > { %v708_v8 = vpop.permute.xlu0 %707 }
  0xad   : > { %v710_v11 = vpop.permute.xlu1 %709  ;;  %v1008_v33 = vsel %vm1002_vm5, %v975_v31, %v708_v8 }
  0xae   : > { %920 = vrot.lane.b32.xlu0 %v650_v50, %s2280_s5  ;;  %v1010_v46 = vsel %vm1002_vm5, %v977_v42, %v710_v11  ;;  %v2624_v11 = vld [vmem:[%s2329_s20 + $0xa8] sm:$0xff]  }
  0xaf   : > { %605 = vrot.lane.b32.xlu1 %v524_v36, %s2276_s24  ;;  %v2240_v36 = vld [vmem:[%s2329_s20 + $0xa4] ss:$0 sps:$4 sm:$0x11]   ;;  %v562_v20 = vshrl.u32 %v2624_v11, 16 }
  0xb0   : > { %v755_v13 = vpop.permute.xlu0 %754  ;;  %v557_v51 = vshll.u32 %v2240_v36, 16  ;;  %v658_v7 = vrot.slane %v2240_v36, 1 }
  0xb1   : > { %v757_v17 = vpop.permute.xlu1 %756  ;;  %v1041_v0 = vsel %vm1035_vm6, %v1008_v33, %v755_v13  ;;  %v660_v33 = vrot.slane %v2624_v11, 1 }
  0xb2   : > { %922 = vrot.lane.b32.xlu0 %v653_v12, %s2280_s5  ;;  %v1043_v52 = vsel %vm1035_vm6, %v1010_v46, %v757_v17  ;;  %v559_v61 = vrot.slane %v557_v51, 1  ;;  %v659_v13 = vsel %vm617_vm0, %v657_v6, %v658_v7  ;;  %v564_v17 = vshll.u32 %v2624_v11, 16 }
  0xb3   : > { %607 = vrot.lane.b32.xlu1 %v536_v4, %s2276_s24  ;;  %v574_v46 = vshrl.u32 %v2637_v29, 16  ;;  %v663_v6 = vrot.slane %v2637_v29, 1 }
  0xb4   : > { %v790_v18 = vpop.permute.xlu0 %789  ;;  %v566_v21 = vrot.slane %v564_v17, 1  ;;  %v2246_v17 = vld [vmem:[%s2329_s20 + $0xc8] ss:$0 sps:$4 sm:$0x11]  }
  0xb5   : > { %v792_v22 = vpop.permute.xlu1 %791  ;;  %v1074_v41 = vsel %vm1068_vm7, %v1041_v0, %v790_v18  ;;  %v2244_v0 = vld [vmem:[%s2329_s20 + $0xbc] ss:$0 sps:$4 sm:$0x11]  }
  0xb6   : > { %686 = vrot.lane.b32.xlu0 %v650_v50, %s2275_s23  ;;  %v1076_v55 = vsel %vm1068_vm7, %v1043_v52, %v792_v22  ;;  %v569_v22 = vshll.u32 %v2242_v16, 16  ;;  %v567_v26 = vor.u32 %v566_v21, %v562_v20  ;;  %v581_v51 = vshll.u32 %v2244_v0, 16 }
  0xb7   : > { %688 = vrot.lane.b32.xlu1 %v653_v12, %s2275_s23  ;;  %v664_v7 = vrot.slane %v2244_v0, 1 }
  0xb8   : > { %v827_v24 = vpop.permute.xlu0 %826 }
  0xb9   : > { %v829_v3 = vpop.permute.xlu1 %828  ;;  %v1107_v43 = vsel %vm1101_vm8, %v1074_v41, %v827_v24 }
  0xba   : > { %723 = vrot.lane.b32.xlu0 %v2526_v28, %s2273_s21  ;;  %v1109_v56 = vsel %vm1101_vm8, %v1076_v55, %v829_v3  ;;  %v571_v3 = vrot.slane %v569_v22, 1 }
  0xbb   : > { %725 = vrot.lane.b32.xlu1 %v2566_v10, %s2273_s21 }
  0xbc   : > { %v874_v34 = vpop.permute.xlu0 %873  ;;  %v572_v37 = vsel %vm392_vm1, %v567_v26, %v571_v3 }
  0xbd   : > { %v876_v38 = vpop.permute.xlu1 %875  ;;  %v1140_v47 = vsel %vm1134_vm9, %v1107_v43, %v874_v34  ;;  %v661_v34 = vrot.slane %v2242_v16, 1 }
  0xbe   : > { %770 = vrot.lane.b32.xlu0 %v536_v4, %s2277_s25  ;;  %v1142_v57 = vsel %vm1134_vm9, %v1109_v56, %v876_v38  ;;  %v560_v4 = vsel %vm392_vm1, %v555_v59, %v559_v61  ;;  %v576_v38 = vshll.u32 %v2637_v29, 16  ;;  %v583_v61 = vrot.slane %v581_v51, 1 }
  0xbf   : > { %772 = vrot.lane.b32.xlu1 %v548_v35, %s2277_s25  ;;  %v662_v45 = vsel %vm617_vm0, %v660_v33, %v661_v34 }
  0xc0   : > { %v909_v50 = vpop.permute.xlu0 %908 }
  0xc1   : > { %v594_v53 = vpop.permute.xlu1 %593  ;;  %v1173_v54 = vsel %vm1167_vm10, %v1140_v47, %v909_v50 }
  0xc2   : > { %805 = vrot.lane.b32.xlu0 %v653_v12, %s2274_s22  ;;  %2141 = vmatprep.mubr.msk.bf16.mxu0 %vm1220_vm11, %v1173_v54  ;;  %v946_v32 = vsel %vm936_vm3, %v2388_v48, %v594_v53 }
  0xc3   : > { %807 = vrot.lane.b32.xlu1 %v656_v44, %s2274_s22 }
  0xc4   : > { %v911_v58 = vpop.permute.xlu0 %910 }
  0xc5   : > { %v596_v62 = vpop.permute.xlu1 %595  ;;  %v1175_v63 = vsel %vm1167_vm10, %v1142_v57, %v911_v58 }
  0xc6   : > { %842 = vrot.lane.b32.xlu0 %v2566_v10, %s2278_s26  ;;  %2142 = vmatmul.mubr.msk.bf16.gmra.mxu0 %vm1220_vm11, %v1175_v63  ;;  %v948_v41 = vsel %vm936_vm3, %v2407_v60, %v596_v62  ;;  %v578_v60 = vrot.slane %v576_v38, 1 }
  0xc7   : > { %844 = vrot.lane.b32.xlu1 %v2579_v27, %s2278_s26 }
  0xc8   : > { %v675_v2 = vpop.permute.xlu0 %674  ;;  %v579_v59 = vor.u32 %v578_v60, %v574_v46 }
  0xc9   : > { %v677_v5 = vpop.permute.xlu1 %676  ;;  %v979_v1 = vsel %vm969_vm4, %v946_v32, %v675_v2  ;;  %v2247_v32 = vld [vmem:[%s2329_s20 + $0xcc] sm:$0xff]  }
  0xca   : > { %889 = vrot.lane.b32.xlu0 %v548_v35, %s2279_s27  ;;  %v981_v43 = vsel %vm969_vm4, %v948_v41, %v677_v5 }
  0xcb   : > { %891 = vrot.lane.b32.xlu1 %v560_v4, %s2279_s27 }
  0xcc   : > { %v712_v8 = vpop.permute.xlu0 %711 }
  0xcd   : > { %v714_v12 = vpop.permute.xlu1 %713 }
  0xce   : > { %924 = vrot.lane.b32.xlu0 %v656_v44, %s2280_s5  ;;  %v1014_v47 = vsel %vm1002_vm5, %v981_v43, %v714_v12  ;;  %v2682_v12 = vld [vmem:[%s2329_s20 + $0xc0] sm:$0xff]  }
  0xcf   : > { %609 = vrot.lane.b32.xlu1 %v548_v35, %s2276_s24  ;;  %v1012_v35 = vsel %vm1002_vm5, %v979_v1, %v712_v8  ;;  %v739_v21 = vshrl.u32 %v2682_v12, 16 }
  0xd0   : > { %v759_v15 = vpop.permute.xlu0 %758 }
  0xd1   : > { %v761_v18 = vpop.permute.xlu1 %760  ;;  %v1045_v48 = vsel %vm1035_vm6, %v1012_v35, %v759_v15  ;;  %v665_v15 = vsel %vm617_vm0, %v663_v6, %v664_v7  ;;  %v782_v35 = vrot.slane %v2682_v12, 1 }
  0xd2   : > { %926 = vrot.lane.b32.xlu0 %v659_v13, %s2280_s5  ;;  %v1047_v52 = vsel %vm1035_vm6, %v1014_v47, %v761_v18  ;;  %v741_v18 = vshll.u32 %v2682_v12, 16  ;;  %v858_v47 = vshrl.u32 %v2247_v32, 16 }
  0xd3   : > { %611 = vrot.lane.b32.xlu1 %v560_v4, %s2276_s24 }
  0xd4   : > { %v794_v19 = vpop.permute.xlu0 %793  ;;  %v743_v22 = vrot.slane %v741_v18, 1 }
  0xd5   : > { %v796_v24 = vpop.permute.xlu1 %795  ;;  %v1078_v42 = vsel %vm1068_vm7, %v1045_v48, %v794_v19  ;;  %v2248_v48 = vld [vmem:[%s2329_s20 + $0xd4] ss:$0 sps:$4 sm:$0x11]   ;;  %s2970_s20 = scalar_lea.vmem %s3052_s3, %s1895_s17 }
  0xd6   : > { %690 = vrot.lane.b32.xlu0 %v656_v44, %s2275_s23  ;;  %v1080_v55 = vsel %vm1068_vm7, %v1047_v52, %v796_v24  ;;  %v746_v24 = vshll.u32 %v2246_v17, 16  ;;  %v744_v3 = vor.u32 %v743_v22, %v739_v21  ;;  %v902_v6 = vrot.slane %v2248_v48, 1 }
  0xd7   : > { %692 = vrot.lane.b32.xlu1 %v659_v13, %s2275_s23 }
  0xd8   : > { %v831_v25 = vpop.permute.xlu0 %830 }
  0xd9   : > { %v833_v31 = vpop.permute.xlu1 %832  ;;  %v1111_v44 = vsel %vm1101_vm8, %v1078_v42, %v831_v25 }
  0xda   : > { %727 = vrot.lane.b32.xlu0 %v2579_v27, %s2273_s21  ;;  %v1113_v56 = vsel %vm1101_vm8, %v1080_v55, %v833_v31  ;;  %v748_v31 = vrot.slane %v746_v24, 1 }
  0xdb   : > { %729 = vrot.lane.b32.xlu1 %v2624_v11, %s2273_s21 }
  0xdc   : > { %v878_v36 = vpop.permute.xlu0 %877  ;;  %v749_v38 = vsel %vm392_vm1, %v744_v3, %v748_v31 }
  0xdd   : > { %v880_v40 = vpop.permute.xlu1 %879  ;;  %v1144_v50 = vsel %vm1134_vm9, %v1111_v44, %v878_v36  ;;  %v783_v36 = vrot.slane %v2246_v17, 1 }
  0xde   : > { %774 = vrot.lane.b32.xlu0 %v560_v4, %s2277_s25  ;;  %v1146_v57 = vsel %vm1134_vm9, %v1113_v56, %v880_v40  ;;  %v584_v4 = vsel %vm392_vm1, %v579_v59, %v583_v61  ;;  %v860_v40 = vshll.u32 %v2247_v32, 16 }
  0xdf   : > { %776 = vrot.lane.b32.xlu1 %v572_v37, %s2277_s25  ;;  %v784_v46 = vsel %vm617_vm0, %v782_v35, %v783_v36 }
  0xe0   : > { %v913_v30 = vpop.permute.xlu0 %912  ;;  %v862_v51 = vrot.slane %v860_v40, 1 }
  0xe1   : > { %v598_v53 = vpop.permute.xlu1 %597  ;;  %v1177_v54 = vsel %vm1167_vm10, %v1144_v50, %v913_v30 }
  0xe2   : > { %809 = vrot.lane.b32.xlu0 %v659_v13, %s2274_s22  ;;  %2145 = vmatprep.mubr.msk.bf16.mxu0 %vm1220_vm11, %v1177_v54  ;;  %v950_v33 = vsel %vm936_vm3, %v2432_v14, %v598_v53  ;;  %v863_v59 = vor.u32 %v862_v51, %v858_v47 }
  0xe3   : > { %811 = vrot.lane.b32.xlu1 %v662_v45, %s2274_s22 }
  0xe4   : > { %v915_v58 = vpop.permute.xlu0 %914 }
  0xe5   : > { %v600_v62 = vpop.permute.xlu1 %599  ;;  %v1179_v63 = vsel %vm1167_vm10, %v1146_v57, %v915_v58 }
  0xe6   : > { %846 = vrot.lane.b32.xlu0 %v2624_v11, %s2278_s26  ;;  %2146 = vmatmul.mubr.msk.bf16.gmra.mxu0 %vm1220_vm11, %v1179_v63  ;;  %v952_v42 = vsel %vm936_vm3, %v2445_v23, %v600_v62  ;;  %v865_v23 = vshll.u32 %v2248_v48, 16 }
  0xe7   : > { %848 = vrot.lane.b32.xlu1 %v2637_v29, %s2278_s26 }
  0xe8   : > { %v679_v2 = vpop.permute.xlu0 %678  ;;  %v867_v61 = vrot.slane %v865_v23, 1 }
  0xe9   : > { %v681_v5 = vpop.permute.xlu1 %680  ;;  %v983_v34 = vsel %vm969_vm4, %v950_v33, %v679_v2 }
  0xea   : > { %893 = vrot.lane.b32.xlu0 %v572_v37, %s2279_s27  ;;  %v985_v44 = vsel %vm969_vm4, %v952_v42, %v681_v5  ;;  %v901_v5 = vrot.slane %v2247_v32, 1 }
  0xeb   : > { %895 = vrot.lane.b32.xlu1 %v584_v4, %s2279_s27 }
  0xec   : > { %v716_v8 = vpop.permute.xlu0 %715 }
  0xed   : > { %v718_v13 = vpop.permute.xlu1 %717 }
  0xee   : > { %928 = vrot.lane.b32.xlu0 %v662_v45, %s2280_s5  ;;  %v1018_v50 = vsel %vm1002_vm5, %v985_v44, %v718_v13  ;;  %v903_v13 = vsel %vm617_vm0, %v901_v5, %v902_v6 }
  0xef   : > { %613 = vrot.lane.b32.xlu1 %v572_v37, %s2276_s24  ;;  %v1016_v37 = vsel %vm1002_vm5, %v983_v34, %v716_v8 }
  0xf0   : > { %v763_v16 = vpop.permute.xlu0 %762 }
  0xf1   : > { %v765_v19 = vpop.permute.xlu1 %764  ;;  %v1049_v14 = vsel %vm1035_vm6, %v1016_v37, %v763_v16 }
  0xf2   : > { %930 = vrot.lane.b32.xlu0 %v665_v15, %s2280_s5  ;;  %v1051_v52 = vsel %vm1035_vm6, %v1018_v50, %v765_v19 }
  0xf3   : > { %615 = vrot.lane.b32.xlu1 %v584_v4, %s2276_s24 }
  0xf4   : > { %v798_v20 = vpop.permute.xlu0 %797 }
  0xf5   : > { %v800_v25 = vpop.permute.xlu1 %799  ;;  %v1082_v43 = vsel %vm1068_vm7, %v1049_v14, %v798_v20 }
  0xf6   : > { %694 = vrot.lane.b32.xlu0 %v662_v45, %s2275_s23  ;;  %v1084_v55 = vsel %vm1068_vm7, %v1051_v52, %v800_v25 }
  0xf7   : > { %696 = vrot.lane.b32.xlu1 %v665_v15, %s2275_s23 }
  0xf8   : > { %v835_v26 = vpop.permute.xlu0 %834 }
  0xf9   : > { %v837_v1 = vpop.permute.xlu1 %836  ;;  %v1115_v45 = vsel %vm1101_vm8, %v1082_v43, %v835_v26 }
  0xfa   : > { %731 = vrot.lane.b32.xlu0 %v2637_v29, %s2273_s21  ;;  %v1117_v56 = vsel %vm1101_vm8, %v1084_v55, %v837_v1 }
  0xfb   : > { %733 = vrot.lane.b32.xlu1 %v2682_v12, %s2273_s21 }
  0xfc   : > { %v882_v0 = vpop.permute.xlu0 %881 }
  0xfd   : > { %v884_v41 = vpop.permute.xlu1 %883  ;;  %v1148_v30 = vsel %vm1134_vm9, %v1115_v45, %v882_v0 }
  0xfe   : > { %778 = vrot.lane.b32.xlu0 %v584_v4, %s2277_s25  ;;  %v1150_v57 = vsel %vm1134_vm9, %v1117_v56, %v884_v41  ;;  %v868_v4 = vsel %vm392_vm1, %v863_v59, %v867_v61 }
  0xff   : > { %780 = vrot.lane.b32.xlu1 %v749_v38, %s2277_s25 }
 0x100   : > { %v917_v60 = vpop.permute.xlu0 %916 }
 0x101   : > { %v602_v53 = vpop.permute.xlu1 %601  ;;  %v1181_v54 = vsel %vm1167_vm10, %v1148_v30, %v917_v60 }
 0x102   : > { %813 = vrot.lane.b32.xlu0 %v665_v15, %s2274_s22  ;;  %2149 = vmatprep.mubr.msk.bf16.mxu0 %vm1220_vm11, %v1181_v54  ;;  %v954_v21 = vsel %vm936_vm3, %v2470_v39, %v602_v53 }
 0x103   : > { %815 = vrot.lane.b32.xlu1 %v784_v46, %s2274_s22 }
 0x104   : > { %v919_v58 = vpop.permute.xlu0 %918 }
 0x105   : > { %v604_v62 = vpop.permute.xlu1 %603  ;;  %v1183_v63 = vsel %vm1167_vm10, %v1150_v57, %v919_v58 }
 0x106   : > { %850 = vrot.lane.b32.xlu0 %v2682_v12, %s2278_s26  ;;  %2150 = vmatmul.mubr.msk.bf16.gmra.mxu0 %vm1220_vm11, %v1183_v63  ;;  %v956_v31 = vsel %vm936_vm3, %v2483_v49, %v604_v62 }
 0x107   : > { %852 = vrot.lane.b32.xlu1 %v2247_v32, %s2278_s26 }
 0x108   : > { %v683_v2 = vpop.permute.xlu0 %682 }
 0x109   : > { %v685_v7 = vpop.permute.xlu1 %684  ;;  %v987_v22 = vsel %vm969_vm4, %v954_v21, %v683_v2 }
 0x10a   : > { %897 = vrot.lane.b32.xlu0 %v749_v38, %s2279_s27  ;;  %v989_v1 = vsel %vm969_vm4, %v956_v31, %v685_v7 }
 0x10b   : > { %899 = vrot.lane.b32.xlu1 %v868_v4, %s2279_s27 }
 0x10c   : > { %v720_v8 = vpop.permute.xlu0 %719 }
 0x10d   : > { %v722_v15 = vpop.permute.xlu1 %721  ;;  %v1020_v24 = vsel %vm1002_vm5, %v987_v22, %v720_v8 }
 0x10e   : > { %932 = vrot.lane.b32.xlu0 %v784_v46, %s2280_s5  ;;  %v1022_v34 = vsel %vm1002_vm5, %v989_v1, %v722_v15 }
 0x10f   : > { %934 = vrot.lane.b32.xlu1 %v903_v13, %s2280_s5 }
 0x110   : > { %v767_v12 = vpop.permute.xlu0 %766 }
 0x111   : > { %v769_v16 = vpop.permute.xlu1 %768  ;;  %v1053_v26 = vsel %vm1035_vm6, %v1020_v24, %v767_v12 }
 0x112   : > { %v1055_v36 = vsel %vm1035_vm6, %v1022_v34, %v769_v16 }
 0x114   : > { %v802_v17 = vpop.permute.xlu0 %801 }
 0x115   : > { %v804_v18 = vpop.permute.xlu1 %803  ;;  %v1086_v32 = vsel %vm1068_vm7, %v1053_v26, %v802_v17 }
 0x116   : > { %v1088_v38 = vsel %vm1068_vm7, %v1055_v36, %v804_v18 }
 0x118   : > { %v839_v19 = vpop.permute.xlu0 %838 }
 0x119   : > { %v841_v20 = vpop.permute.xlu1 %840  ;;  %v1119_v33 = vsel %vm1101_vm8, %v1086_v32, %v839_v19 }
 0x11a   : > { %v1121_v49 = vsel %vm1101_vm8, %v1088_v38, %v841_v20 }
 0x11c   : > { %v886_v25 = vpop.permute.xlu0 %885 }
 0x11d   : > { %v888_v3 = vpop.permute.xlu1 %887  ;;  %v1152_v39 = vsel %vm1134_vm9, %v1119_v33, %v886_v25 }
 0x11e   : > { %v1154_v48 = vsel %vm1134_vm9, %v1121_v49, %v888_v3 }
 0x120   : > { %v921_v35 = vpop.permute.xlu0 %920 }
 0x121   : > { %v606_v37 = vpop.permute.xlu1 %605  ;;  %v1185_v0 = vsel %vm1167_vm10, %v1152_v39, %v921_v35 }
 0x122   : > { %2153 = vmatprep.mubr.msk.bf16.mxu1 %vm1220_vm11, %v1185_v0  ;;  %v958_v23 = vsel %vm936_vm3, %v2508_v9, %v606_v37 }
 0x124   : > { %v923_v40 = vpop.permute.xlu0 %922 }
 0x125   : > { %v608_v14 = vpop.permute.xlu1 %607  ;;  %v1187_v41 = vsel %vm1167_vm10, %v1154_v48, %v923_v40 }
 0x126   : > { %2154 = vmatmul.mubr.msk.bf16.vlgmr.msra.gmra.mxu1 %vm1220_vm11, %v1187_v41  ;;  %v960_v57 = vsel %vm936_vm3, %v2526_v28, %v608_v14 }
 0x128   : > { %v687_v42 = vpop.permute.xlu0 %686 }
 0x129   : > { %v689_v43 = vpop.permute.xlu1 %688  ;;  %v991_v52 = vsel %vm969_vm4, %v958_v23, %v687_v42 }
 0x12a   : > { %v993_v59 = vsel %vm969_vm4, %v960_v57, %v689_v43 }
 0x12c   : > { %v724_v44 = vpop.permute.xlu0 %723 }
 0x12d   : > { %v726_v45 = vpop.permute.xlu1 %725  ;;  %v1024_v53 = vsel %vm1002_vm5, %v991_v52, %v724_v44 }
 0x12e   : > { %v1026_v62 = vsel %vm1002_vm5, %v993_v59, %v726_v45 }
 0x130   : > { %v771_v46 = vpop.permute.xlu0 %770 }
 0x131   : > { %v773_v47 = vpop.permute.xlu1 %772  ;;  %v1057_v55 = vsel %vm1035_vm6, %v1024_v53, %v771_v46 }
 0x132   : > { %v1059_v2 = vsel %vm1035_vm6, %v1026_v62, %v773_v47 }
 0x134   : > { %v806_v50 = vpop.permute.xlu0 %805 }
 0x135   : > { %v808_v30 = vpop.permute.xlu1 %807  ;;  %v1090_v58 = vsel %vm1068_vm7, %v1057_v55, %v806_v50 }
 0x136   : > { %v1092_v6 = vsel %vm1068_vm7, %v1059_v2, %v808_v30 }
 0x138   : > { %v843_v60 = vpop.permute.xlu0 %842 }
 0x139   : > { %v845_v51 = vpop.permute.xlu1 %844  ;;  %v1123_v61 = vsel %vm1101_vm8, %v1090_v58, %v843_v60 }
 0x13a   : > { %v1125_v28 = vsel %vm1101_vm8, %v1092_v6, %v845_v51 }
 0x13c   : > { %v890_v54 = vpop.permute.xlu0 %889 }
 0x13d   : > { %v892_v56 = vpop.permute.xlu1 %891  ;;  %v1156_v9 = vsel %vm1134_vm9, %v1123_v61, %v890_v54 }
 0x13e   : > { %v1158_v7 = vsel %vm1134_vm9, %v1125_v28, %v892_v56 }
 0x140   : > { %v925_v63 = vpop.permute.xlu0 %924 }
 0x141   : > { %v610_v4 = vpop.permute.xlu1 %609  ;;  %v1189_v5 = vsel %vm1167_vm10, %v1156_v9, %v925_v63 }
 0x142   : > { %2157 = vmatprep.mubr.msk.bf16.mxu1 %vm1220_vm11, %v1189_v5  ;;  %v962_v26 = vsel %vm936_vm3, %v2566_v10, %v610_v4 }
 0x144   : > { %v927_v8 = vpop.permute.xlu0 %926 }
 0x145   : > { %v612_v13 = vpop.permute.xlu1 %611  ;;  %v1191_v15 = vsel %vm1167_vm10, %v1158_v7, %v927_v8 }
 0x146   : > { %2158 = vmatmul.mubr.msk.bf16.gmra.mxu1 %vm1220_vm11, %v1191_v15  ;;  %v964_v34 = vsel %vm936_vm3, %v2579_v27, %v612_v13 }
 0x148   : > { %v691_v12 = vpop.permute.xlu0 %690 }
 0x149   : > { %v693_v16 = vpop.permute.xlu1 %692  ;;  %v995_v3 = vsel %vm969_vm4, %v962_v26, %v691_v12 }
 0x14a   : > { %v997_v35 = vsel %vm969_vm4, %v964_v34, %v693_v16 }
 0x14c   : > { %v728_v17 = vpop.permute.xlu0 %727 }
 0x14d   : > { %v730_v18 = vpop.permute.xlu1 %729  ;;  %v1028_v31 = vsel %vm1002_vm5, %v995_v3, %v728_v17 }
 0x14e   : > { %v1030_v10 = vsel %vm1002_vm5, %v997_v35, %v730_v18 }
 0x150   : > { %v775_v19 = vpop.permute.xlu0 %774 }
 0x151   : > { %v777_v20 = vpop.permute.xlu1 %776  ;;  %v1061_v1 = vsel %vm1035_vm6, %v1028_v31, %v775_v19 }
 0x152   : > { %v1063_v38 = vsel %vm1035_vm6, %v1030_v10, %v777_v20 }
 0x154   : > { %v810_v21 = vpop.permute.xlu0 %809 }
 0x155   : > { %v812_v22 = vpop.permute.xlu1 %811  ;;  %v1094_v39 = vsel %vm1068_vm7, %v1061_v1, %v810_v21 }
 0x156   : > { %v1096_v40 = vsel %vm1068_vm7, %v1063_v38, %v812_v22 }
 0x158   : > { %v847_v24 = vpop.permute.xlu0 %846 }
 0x159   : > { %v849_v25 = vpop.permute.xlu1 %848  ;;  %v1127_v36 = vsel %vm1101_vm8, %v1094_v39, %v847_v24 }
 0x15a   : > { %v1129_v27 = vsel %vm1101_vm8, %v1096_v40, %v849_v25 }
 0x15c   : > { %v894_v32 = vpop.permute.xlu0 %893 }
 0x15d   : > { %v896_v33 = vpop.permute.xlu1 %895  ;;  %v1160_v37 = vsel %vm1134_vm9, %v1127_v36, %v894_v32 }
 0x15e   : > { %v1162_v14 = vsel %vm1134_vm9, %v1129_v27, %v896_v33 }
 0x160   : > { %v929_v0 = vpop.permute.xlu0 %928 }
 0x161   : > { %v614_v49 = vpop.permute.xlu1 %613  ;;  %v1193_v48 = vsel %vm1167_vm10, %v1160_v37, %v929_v0 }
 0x162   : > { %2161 = vmatprep.mubr.msk.bf16.mxu1 %vm1220_vm11, %v1193_v48  ;;  %v966_v59 = vsel %vm936_vm3, %v2624_v11, %v614_v49 }
 0x164   : > { %v931_v41 = vpop.permute.xlu0 %930 }
 0x165   : > { %v616_v42 = vpop.permute.xlu1 %615  ;;  %v1195_v43 = vsel %vm1167_vm10, %v1162_v14, %v931_v41 }
 0x166   : > { %v2796_v44 = vpop.f32.mrf.mxu0  ;;  %2162 = vmatmul.mubr.msk.bf16.gmra.mxu1 %vm1220_vm11, %v1195_v43  ;;  %v968_v61 = vsel %vm936_vm3, %v2637_v29, %v616_v42 }
 0x168   : > { %v2799_v45 = vpop.f32.mrf.mxu0  ;;  %v695_v46 = vpop.permute.xlu0 %694 }
 0x169   : > { %v697_v47 = vpop.permute.xlu1 %696  ;;  %v999_v62 = vsel %vm969_vm4, %v966_v59, %v695_v46 }
 0x16a   : > { %v2806_v50 = vpop.f32.mrf.mxu0  ;;  %v1001_v9 = vsel %vm969_vm4, %v968_v61, %v697_v47 }
 0x16b   : > { %v2025_v30 = vpack.c.bf16 %v2806_v50, %v2796_v44 }
 0x16c   : > { %v2810_v60 = vpop.f32.mrf.mxu0  ;;  %v732_v51 = vpop.permute.xlu0 %731 }
 0x16d   : > { %2097 = vst [vmem:[%s2804_s12 + $0x8] sm:$0xff] %v2025_v30   ;;  %v734_v23 = vpop.permute.xlu1 %733  ;;  %v2020_v52 = vpack.c.bf16 %v2810_v60, %v2799_v45  ;;  %v1032_v63 = vsel %vm1002_vm5, %v999_v62, %v732_v51  ;;  %v1642_v14 = vadd.f32 %v2810_v60, %v2799_v45 }
 0x16e   : > { %v1034_v4 = vsel %vm1002_vm5, %v1001_v9, %v734_v23 }
 0x16f   : > { %2021 = vst [vmem:[%s2804_s12] sm:$0xff] %v2020_v52   ;;  %v1643_v41 = vadd.f32 %v2796_v44, %v1642_v14 }
 0x170   : > { %v779_v53 = vpop.permute.xlu0 %778 }
 0x171   : > { %v781_v54 = vpop.permute.xlu1 %780  ;;  %v1065_v5 = vsel %vm1035_vm6, %v1032_v63, %v779_v53  ;;  %v1644_v42 = vadd.f32 %v2806_v50, %v1643_v41 }
 0x172   : > { %v1067_v28 = vsel %vm1035_vm6, %v1034_v4, %v781_v54 }
 0x174   : > { %v814_v55 = vpop.permute.xlu0 %813 }
 0x175   : > { %v816_v56 = vpop.permute.xlu1 %815  ;;  %v1098_v7 = vsel %vm1068_vm7, %v1065_v5, %v814_v55 }
 0x176   : > { %v1100_v11 = vsel %vm1068_vm7, %v1067_v28, %v816_v56 }
 0x178   : > { %v851_v57 = vpop.permute.xlu0 %850 }
 0x179   : > { %v853_v58 = vpop.permute.xlu1 %852  ;;  %v1131_v29 = vsel %vm1101_vm8, %v1098_v7, %v851_v57 }
 0x17a   : > { %v1133_v8 = vsel %vm1101_vm8, %v1100_v11, %v853_v58 }
 0x17c   : > { %v898_v2 = vpop.permute.xlu0 %897 }
 0x17d   : > { %v900_v6 = vpop.permute.xlu1 %899  ;;  %v1164_v13 = vsel %vm1134_vm9, %v1131_v29, %v898_v2 }
 0x17e   : > { %v1166_v12 = vsel %vm1134_vm9, %v1133_v8, %v900_v6 }
 0x180   : > { %v933_v15 = vpop.permute.xlu0 %932 }
 0x181   : > { %v935_v16 = vpop.permute.xlu1 %934  ;;  %v1197_v17 = vsel %vm1167_vm10, %v1164_v13, %v933_v15 }
 0x182   : > { %v1199_v18 = vsel %vm1167_vm10, %v1166_v12, %v935_v16  ;;  %2165 = vmatprep.mubr.msk.bf16.mxu1 %vm1220_vm11, %v1197_v17 }
 0x183   : > { %2166 = vmatmul.mubr.msk.bf16.gmra.mxu1 %vm1220_vm11, %v1199_v18 }
 0x186   : > { %v2836_v19 = vpop.f32.mrf.mxu0 }
 0x188   : > { %v2838_v20 = vpop.f32.mrf.mxu0 }
 0x189   : > { %v1645_v43 = vadd.f32 %v1644_v42, %v2838_v20 }
 0x18a   : > { %v2840_v21 = vpop.f32.mrf.mxu0 }
 0x18b   : > { %v2035_v22 = vpack.c.bf16 %v2840_v21, %v2836_v19 }
 0x18c   : > { %v2844_v24 = vpop.f32.mrf.mxu0 }
 0x18d   : > { %2099 = vst [vmem:[%s2804_s12 + $0x18] sm:$0xff] %v2035_v22   ;;  %v2030_v25 = vpack.c.bf16 %v2844_v24, %v2838_v20  ;;  %v1646_v46 = vadd.f32 %v1645_v43, %v2844_v24 }
 0x18f   : > { %2098 = vst [vmem:[%s2804_s12 + $0x10] sm:$0xff] %v2030_v25   ;;  %v1647_v47 = vadd.f32 %v2836_v19, %v1646_v46 }
 0x191   : > { %v1648_v23 = vadd.f32 %v2840_v21, %v1647_v47 }
 0x1a6   : > { %v2850_v26 = vpop.f32.mrf.mxu0 }
 0x1a8   : > { %v2852_v3 = vpop.f32.mrf.mxu0 }
 0x1a9   : > { %v1649_v54 = vadd.f32 %v1648_v23, %v2852_v3 }
 0x1aa   : > { %v2854_v31 = vpop.f32.mrf.mxu0 }
 0x1ab   : > { %v2045_v32 = vpack.c.bf16 %v2854_v31, %v2850_v26 }
 0x1ac   : > { %v2858_v1 = vpop.f32.mrf.mxu0 }
 0x1ad   : > { %2101 = vst [vmem:[%s2804_s12 + $0x28] sm:$0xff] %v2045_v32   ;;  %v2040_v33 = vpack.c.bf16 %v2858_v1, %v2852_v3  ;;  %v1650_v57 = vadd.f32 %v1649_v54, %v2858_v1 }
 0x1af   : > { %2100 = vst [vmem:[%s2804_s12 + $0x20] sm:$0xff] %v2040_v33   ;;  %v1651_v58 = vadd.f32 %v2850_v26, %v1650_v57 }
 0x1b1   : > { %v1652_v59 = vadd.f32 %v2854_v31, %v1651_v58 }
 0x1c6   : > { %v2864_v34 = vpop.f32.mrf.mxu0 }
 0x1c8   : > { %v2866_v39 = vpop.f32.mrf.mxu0 }
 0x1c9   : > { %v1653_v61 = vadd.f32 %v1652_v59, %v2866_v39 }
 0x1ca   : > { %v2868_v35 = vpop.f32.mrf.mxu0 }
 0x1cb   : > { %v2055_v36 = vpack.c.bf16 %v2868_v35, %v2864_v34 }
 0x1cc   : > { %v2872_v10 = vpop.f32.mrf.mxu0 }
 0x1cd   : > { %2103 = vst [vmem:[%s2804_s12 + $0x38] sm:$0xff] %v2055_v36   ;;  %v2050_v37 = vpack.c.bf16 %v2872_v10, %v2866_v39  ;;  %v1654_v62 = vadd.f32 %v1653_v61, %v2872_v10 }
 0x1cf   : > { %2102 = vst [vmem:[%s2804_s12 + $0x30] sm:$0xff] %v2050_v37   ;;  %v1655_v9 = vadd.f32 %v2864_v34, %v1654_v62 }
 0x1d1   : > { %v1656_v63 = vadd.f32 %v2868_v35, %v1655_v9 }
 0x1e6   : > { %v2878_v0 = vpop.f32.mrf.mxu1 }
 0x1e8   : > { %v2880_v38 = vpop.f32.mrf.mxu1 }
 0x1e9   : > { %v1657_v2 = vadd.f32 %v1656_v63, %v2880_v38 }
 0x1ea   : > { %v2882_v49 = vpop.f32.mrf.mxu1 }
 0x1eb   : > { %v2065_v48 = vpack.c.bf16 %v2882_v49, %v2878_v0 }
 0x1ec   : > { %v2886_v40 = vpop.f32.mrf.mxu1 }
 0x1ed   : > { %2105 = vst [vmem:[%s2804_s12 + $0x48] sm:$0xff] %v2065_v48   ;;  %v2060_v27 = vpack.c.bf16 %v2886_v40, %v2880_v38  ;;  %v1658_v4 = vadd.f32 %v1657_v2, %v2886_v40 }
 0x1ef   : > { %2104 = vst [vmem:[%s2804_s12 + $0x40] sm:$0xff] %v2060_v27   ;;  %v1659_v28 = vadd.f32 %v2878_v0, %v1658_v4 }
 0x1f1   : > { %v1660_v13 = vadd.f32 %v2882_v49, %v1659_v28 }
 0x206   : > { %v2899_v30 = vpop.f32.mrf.mxu1 }
 0x208   : > { %v2901_v51 = vpop.f32.mrf.mxu1 }
 0x209   : > { %v1661_v15 = vadd.f32 %v1660_v13, %v2901_v51 }
 0x20a   : > { %v2904_v52 = vpop.f32.mrf.mxu1 }
 0x20b   : > { %v2075_v53 = vpack.c.bf16 %v2904_v52, %v2899_v30 }
 0x20c   : > { %v2909_v55 = vpop.f32.mrf.mxu1 }
 0x20d   : > { %2107 = vst [vmem:[%s2804_s12 + $0x58] sm:$0xff] %v2075_v53   ;;  %v2070_v56 = vpack.c.bf16 %v2909_v55, %v2901_v51  ;;  %v1662_v12 = vadd.f32 %v1661_v15, %v2909_v55 }
 0x20f   : > { %2106 = vst [vmem:[%s2804_s12 + $0x50] sm:$0xff] %v2070_v56   ;;  %v1663_v16 = vadd.f32 %v2899_v30, %v1662_v12 }
 0x211   : > { %v1664_v17 = vadd.f32 %v2904_v52, %v1663_v16 }
 0x226   : > { %v2924_v5 = vpop.f32.mrf.mxu1 }
 0x228   : > { %v2926_v6 = vpop.f32.mrf.mxu1 }
 0x229   : > { %v1665_v18 = vadd.f32 %v1664_v17, %v2926_v6 }
 0x22a   : > { %v2929_v7 = vpop.f32.mrf.mxu1 }
 0x22b   : > { %v2085_v11 = vpack.c.bf16 %v2929_v7, %v2924_v5 }
 0x22c   : > { %v2933_v29 = vpop.f32.mrf.mxu1 }
 0x22d   : > { %2109 = vst [vmem:[%s2804_s12 + $0x68] sm:$0xff] %v2085_v11   ;;  %v2080_v8 = vpack.c.bf16 %v2933_v29, %v2926_v6  ;;  %v1666_v22 = vadd.f32 %v1665_v18, %v2933_v29 }
 0x22f   : > { %2108 = vst [vmem:[%s2804_s12 + $0x60] sm:$0xff] %v2080_v8   ;;  %v1667_v25 = vadd.f32 %v2924_v5, %v1666_v22 }
 0x231   : > { %v1668_v36 = vadd.f32 %v2929_v7, %v1667_v25 }
 0x243   : > { %v2947_v32 = vpop.f32.mrf.mxu1 }
 0x245   : > { %v2949_v33 = vpop.f32.mrf.mxu1 }
 0x246   : > { %v1669_v48 = vadd.f32 %v1668_v36, %v2949_v33 }
 0x247   : > { %v2952_v37 = vpop.f32.mrf.mxu1 }
 0x248   : > { %v2095_v27 = vpack.c.bf16 %v2952_v37, %v2947_v32 }
 0x249   : > { %v2957_v14 = vpop.f32.mrf.mxu1 }
 0x24a   : > { %2111 = vst [vmem:[%s2804_s12 + $0x78] sm:$0xff] %v2095_v27   ;;  %v2090_v41 = vpack.c.bf16 %v2957_v14, %v2949_v33  ;;  %v1670_v42 = vadd.f32 %v1669_v48, %v2957_v14 }
 0x24c   : > { %2110 = vst [vmem:[%s2804_s12 + $0x70] sm:$0xff] %v2090_v41   ;;  %v1671_v43 = vadd.f32 %v2947_v32, %v1670_v42 }
 0x24e   : > { %v1672_v46 = vadd.f32 %v2952_v37, %v1671_v43 }
 0x250   : > { %v1673_v47 = vrot.slane %v1672_v46, 4 }
 0x252   : > { %v1674_v23 = vadd.f32 %v1673_v47, %v1672_v46 }
 0x254   : > { %v1675_v53 = vrot.slane %v1674_v23, 2 }
 0x256   : > { %v1676_v54 = vadd.f32 %v1675_v53, %v1674_v23 }
 0x258   : > { %v1677_v56 = vrot.slane %v1676_v54, 1 }
 0x25a   : > { %v1678_v57 = vadd.f32 %v1677_v56, %v1676_v54 }
 0x25c   : > { %1712 = vst [vmem:[%s2970_s20] sm:$0x1] %v1678_v57  ;;  %v2973_v58 = vmul.f32 0.00390625, %v1678_v57 }
 0x25e   : > { %v1680_v59 = vsub.f32 %v2799_v45, %v2973_v58  ;;  %v1681_v61 = vsub.f32 %v2810_v60, %v2973_v58  ;;  %v1682_v62 = vsub.f32 %v2796_v44, %v2973_v58  ;;  %v1683_v2 = vsub.f32 %v2806_v50, %v2973_v58 }
 0x25f   : > { %v1684_v4 = vsub.f32 %v2838_v20, %v2973_v58  ;;  %v1685_v8 = vsub.f32 %v2844_v24, %v2973_v58  ;;  %v1686_v60 = vsub.f32 %v2836_v19, %v2973_v58  ;;  %v1687_v12 = vsub.f32 %v2840_v21, %v2973_v58 }
 0x260   : > { %v1713_v9 = vmul.f32 %v1680_v59, %v1680_v59  ;;  %v1714_v63 = vmul.f32 %v1681_v61, %v1681_v61  ;;  %v1715_v28 = vmul.f32 %v1682_v62, %v1682_v62  ;;  %v1716_v45 = vmul.f32 %v1683_v2, %v1683_v2 }
 0x261   : > { %v1717_v15 = vmul.f32 %v1684_v4, %v1684_v4  ;;  %v1718_v16 = vmul.f32 %v1685_v8, %v1685_v8  ;;  %v1688_v20 = vsub.f32 %v2852_v3, %v2973_v58  ;;  %v1719_v17 = vmul.f32 %v1686_v60, %v1686_v60 }
 0x262   : > { %v1745_v11 = vadd.f32 %v1714_v63, %v1713_v9  ;;  %v1689_v24 = vsub.f32 %v2858_v1, %v2973_v58  ;;  %v1720_v22 = vmul.f32 %v1687_v12, %v1687_v12  ;;  %v1690_v19 = vsub.f32 %v2850_v26, %v2973_v58 }
 0x263   : > { %v1721_v36 = vmul.f32 %v1688_v20, %v1688_v20  ;;  %v1691_v21 = vsub.f32 %v2854_v31, %v2973_v58  ;;  %v1692_v3 = vsub.f32 %v2866_v39, %v2973_v58  ;;  %v1693_v1 = vsub.f32 %v2872_v10, %v2973_v58 }
 0x264   : > { %v1746_v13 = vadd.f32 %v1745_v11, %v1715_v28  ;;  %v1722_v27 = vmul.f32 %v1689_v24, %v1689_v24  ;;  %v1723_v42 = vmul.f32 %v1690_v19, %v1690_v19  ;;  %v1694_v26 = vsub.f32 %v2864_v34, %v2973_v58 }
 0x265   : > { %v1724_v46 = vmul.f32 %v1691_v21, %v1691_v21  ;;  %v1725_v23 = vmul.f32 %v1692_v3, %v1692_v3  ;;  %v1695_v31 = vsub.f32 %v2868_v35, %v2973_v58  ;;  %v1726_v54 = vmul.f32 %v1693_v1, %v1693_v1 }
 0x266   : > { %v1747_v44 = vadd.f32 %v1746_v13, %v1716_v45  ;;  %v1696_v39 = vsub.f32 %v2880_v38, %v2973_v58  ;;  %v1727_v57 = vmul.f32 %v1694_v26, %v1694_v26  ;;  %v1697_v10 = vsub.f32 %v2886_v40, %v2973_v58 }
 0x267   : > { %v1728_v61 = vmul.f32 %v1695_v31, %v1695_v31  ;;  %v1698_v34 = vsub.f32 %v2878_v0, %v2973_v58  ;;  %v1699_v35 = vsub.f32 %v2882_v49, %v2973_v58  ;;  %v1700_v38 = vsub.f32 %v2901_v51, %v2973_v58 }
 0x268   : > { %v1748_v50 = vadd.f32 %v1747_v44, %v1717_v15  ;;  %v1729_v9 = vmul.f32 %v1696_v39, %v1696_v39  ;;  %v1730_v2 = vmul.f32 %v1697_v10, %v1697_v10  ;;  %v1701_v40 = vsub.f32 %v2909_v55, %v2973_v58 }
 0x269   : > { %v1731_v28 = vmul.f32 %v1698_v34, %v1698_v34  ;;  %v1732_v8 = vmul.f32 %v1699_v35, %v1699_v35  ;;  %v1702_v0 = vsub.f32 %v2899_v30, %v2973_v58  ;;  %v1733_v13 = vmul.f32 %v1700_v38, %v1700_v38 }
 0x26a   : > { %v1749_v18 = vadd.f32 %v1748_v50, %v1718_v16  ;;  %v1703_v49 = vsub.f32 %v2904_v52, %v2973_v58  ;;  %v1734_v15 = vmul.f32 %v1701_v40, %v1701_v40  ;;  %v1704_v51 = vsub.f32 %v2926_v6, %v2973_v58 }
 0x26b   : > { %v1735_v12 = vmul.f32 %v1702_v0, %v1702_v0  ;;  %v1705_v55 = vsub.f32 %v2933_v29, %v2973_v58  ;;  %v1706_v30 = vsub.f32 %v2924_v5, %v2973_v58  ;;  %v1707_v52 = vsub.f32 %v2929_v7, %v2973_v58 }
 0x26c   : > { %v1750_v25 = vadd.f32 %v1749_v18, %v1719_v17  ;;  %v1736_v50 = vmul.f32 %v1703_v49, %v1703_v49  ;;  %v1737_v17 = vmul.f32 %v1704_v51, %v1704_v51  ;;  %v1708_v6 = vsub.f32 %v2949_v33, %v2973_v58 }
 0x26d   : > { %v1738_v24 = vmul.f32 %v1705_v55, %v1705_v55  ;;  %v1709_v29 = vsub.f32 %v2957_v14, %v2973_v58  ;;  %v1710_v5 = vsub.f32 %v2947_v32, %v2973_v58  ;;  %v1711_v7 = vsub.f32 %v2952_v37, %v2973_v58 }
 0x26e   : > { %v1751_v48 = vadd.f32 %v1750_v25, %v1720_v22  ;;  %v1739_v25 = vmul.f32 %v1706_v30, %v1706_v30  ;;  %v1741_v21 = vmul.f32 %v1708_v6, %v1708_v6 }
 0x270   : > { %v1752_v41 = vadd.f32 %v1751_v48, %v1721_v36  ;;  %v1740_v36 = vmul.f32 %v1707_v52, %v1707_v52 }
 0x272   : > { %v1753_v43 = vadd.f32 %v1752_v41, %v1722_v27  ;;  %v1742_v41 = vmul.f32 %v1709_v29, %v1709_v29 }
 0x274   : > { %v1754_v47 = vadd.f32 %v1753_v43, %v1723_v42  ;;  %v1743_v42 = vmul.f32 %v1710_v5, %v1710_v5  ;;  %v1744_v43 = vmul.f32 %v1711_v7, %v1711_v7 }
 0x276   : > { %v1755_v53 = vadd.f32 %v1754_v47, %v1724_v46 }
 0x278   : > { %v1756_v56 = vadd.f32 %v1755_v53, %v1725_v23 }
 0x27a   : > { %v1757_v59 = vadd.f32 %v1756_v56, %v1726_v54 }
 0x27c   : > { %v1758_v62 = vadd.f32 %v1757_v59, %v1727_v57 }
 0x27e   : > { %v1759_v63 = vadd.f32 %v1758_v62, %v1728_v61 }
 0x280   : > { %v1760_v4 = vadd.f32 %v1759_v63, %v1729_v9 }
 0x282   : > { %v1761_v11 = vadd.f32 %v1760_v4, %v1730_v2 }
 0x284   : > { %v1762_v45 = vadd.f32 %v1761_v11, %v1731_v28 }
 0x286   : > { %v1763_v60 = vadd.f32 %v1762_v45, %v1732_v8 }
 0x288   : > { %v1764_v44 = vadd.f32 %v1763_v60, %v1733_v13 }
 0x28a   : > { %v1765_v16 = vadd.f32 %v1764_v44, %v1734_v15 }
 0x28c   : > { %v1766_v20 = vadd.f32 %v1765_v16, %v1735_v12 }
 0x28e   : > { %v1767_v18 = vadd.f32 %v1766_v20, %v1736_v50 }
 0x290   : > { %v1768_v22 = vadd.f32 %v1767_v18, %v1737_v17 }
 0x292   : > { %v1769_v19 = vadd.f32 %v1768_v22, %v1738_v24 }
 0x294   : > { %v1770_v48 = vadd.f32 %v1769_v19, %v1739_v25 }
 0x296   : > { %v1771_v27 = vadd.f32 %v1770_v48, %v1740_v36 }
 0x298   : > { %v1772_v3 = vadd.f32 %v1771_v27, %v1741_v21 }
 0x29a   : > { %v1773_v33 = vadd.f32 %v1772_v3, %v1742_v41 }
 0x29c   : > { %v1774_v1 = vadd.f32 %v1773_v33, %v1743_v42 }
 0x29e   : > { %v1775_v46 = vadd.f32 %v1774_v1, %v1744_v43 }
 0x2a0   : > { %v1776_v47 = vrot.slane %v1775_v46, 4 }
 0x2a2   : > { %v1777_v14 = vadd.f32 %v1776_v47, %v1775_v46 }
 0x2a4   : > { %v1778_v26 = vrot.slane %v1777_v14, 2 }
 0x2a6   : > { %v1779_v23 = vadd.f32 %v1778_v26, %v1777_v14 }
 0x2a8   : > { %v1780_v53 = vrot.slane %v1779_v23, 1 }
 0x2aa   : > { %v1781_v31 = vadd.f32 %v1780_v53, %v1779_v23 }
 0x2ac   : > { %1782 = vst [vmem:[%s2970_s20 + $0x1] sm:$0x1] %v1781_v31 }
 0x2ad PF: > { %s14_s14 = sadd.s32 1, %s2271_s14   ;;  %s3053_s12 = smov %s2267_s13 }
 0x2ae   : > { %p11_p6 = scmp.ge.s32.totalorder %s14_s14, 4   ;;  %s3054_s13 = smov %s3056_s15 }
 0x2b0   :  { %13 = sbr.rel (!%p11_p6) target bundleno = 2 (0x2), region = 71 }

</bundles_post_ra>
